<compile_context>
chip_gen: v7x
topology: tpu7x:2x2x1
jax: 0.10.0
libtpu: 0.0.40
codegen_flags: <defaults>
</compile_context>

<pallas_src>
import functools

import jax
import jax.numpy as jnp
from jax.experimental import pallas as pl
from jax.experimental.pallas import tpu as pltpu

COMPUTE_DTYPE = jnp.bfloat16          # MXU-friendly storage/compute dtype (f32 accumulation)
VMEM_LIMIT = 32 * 1024 * 1024         # safe on v5e/v6e (128 MiB) and v7x (64 MiB physical)


def _pick_tile(dim, preferred, align):
    """Largest tile <= preferred that divides `dim` and is `align`-aligned, else full dim."""
    if dim <= preferred:
        return dim
    t = (preferred // align) * align
    while t >= align:
        if dim % t == 0:
            return t
        t -= align
    return dim


# ----------------------------- tiled fused linear ---------------------------

def _linear_kernel(x_ref, w_ref, b_ref, o_ref, acc_ref, *, activation):
    @pl.when(pl.program_id(2) == 0)
    def _():
        acc_ref[...] = jnp.zeros_like(acc_ref)

    acc_ref[...] += jnp.dot(x_ref[...], w_ref[...],
                            preferred_element_type=jnp.float32)

    @pl.when(pl.program_id(2) == pl.num_programs(2) - 1)
    def _():
        acc = acc_ref[...] + b_ref[...].astype(jnp.float32)
        if activation == "relu":
            acc = jnp.maximum(acc, 0.0)
        o_ref[...] = acc.astype(o_ref.dtype)            # single fused epilogue store


def linear(x, w, b, activation=None, *, tm=256, tn=512, tk=512):
    """y = act(x @ w + b).  x: [M, K], w: [K, N], b: [N]  (bf16 in, bf16 out, f32 acc)."""
    M, K = x.shape
    _, N = w.shape
    tm = _pick_tile(M, tm, 8)
    tn = _pick_tile(N, tn, 128)
    tk = _pick_tile(K, tk, 128)
    grid = (M // tm, N // tn, K // tk)
    return pl.pallas_call(
        functools.partial(_linear_kernel, activation=activation),
        out_shape=jax.ShapeDtypeStruct((M, N), x.dtype),
        grid_spec=pltpu.PrefetchScalarGridSpec(
            num_scalar_prefetch=0,
            grid=grid,
            in_specs=[
                pl.BlockSpec((tm, tk), lambda i, j, k: (i, k)),
                pl.BlockSpec((tk, tn), lambda i, j, k: (k, j)),
                pl.BlockSpec((1, tn), lambda i, j, k: (0, j)),
            ],
            out_specs=pl.BlockSpec((tm, tn), lambda i, j, k: (i, j)),
            scratch_shapes=[pltpu.VMEM((tm, tn), jnp.float32)],
        ),
        compiler_params=pltpu.CompilerParams(
            dimension_semantics=("parallel", "parallel", "arbitrary"),
            vmem_limit_bytes=VMEM_LIMIT,
        ),
    )(x, w, b.reshape(1, N))


# ------------------------ fused residual-add + layernorm --------------------

def _add_layernorm_kernel(x_ref, y_ref, g_ref, b_ref, o_ref, *, eps):
    x = x_ref[...].astype(jnp.float32) + y_ref[...].astype(jnp.float32)
    mean = jnp.mean(x, axis=-1, keepdims=True)
    var = jnp.mean((x - mean) ** 2, axis=-1, keepdims=True)
    xn = (x - mean) * jax.lax.rsqrt(var + eps)
    out = xn * g_ref[...].astype(jnp.float32) + b_ref[...].astype(jnp.float32)
    o_ref[...] = out.astype(o_ref.dtype)


def add_layernorm(x, y, gamma, beta, eps=1e-5, *, tm=512):
    """LayerNorm(x + y) row-wise (residual fused into the kernel).  x, y: [M, D]."""
    M, D = x.shape
    tm = _pick_tile(M, tm, 8)
    return pl.pallas_call(
        functools.partial(_add_layernorm_kernel, eps=eps),
        out_shape=jax.ShapeDtypeStruct((M, D), x.dtype),
        grid=(M // tm,),
        in_specs=[
            pl.BlockSpec((tm, D), lambda i: (i, 0)),
            pl.BlockSpec((tm, D), lambda i: (i, 0)),
            pl.BlockSpec((1, D), lambda i: (0, 0)),
            pl.BlockSpec((1, D), lambda i: (0, 0)),
        ],
        out_specs=pl.BlockSpec((tm, D), lambda i: (i, 0)),
        compiler_params=pltpu.CompilerParams(
            dimension_semantics=("parallel",),
            vmem_limit_bytes=VMEM_LIMIT,
        ),
    )(x, y, gamma.reshape(1, D), beta.reshape(1, D))


# -------------------------- multi-head self-attention -----------------------

def _mha_kernel(qkv_ref, mask_ref, o_ref, *, nhead, scale):
    S, D3 = qkv_ref.shape
    D = D3 // 3
    Dh = D // nhead
    qkv = qkv_ref[...]                                  # (S, 3D) bf16, one load
    mask = mask_ref[...].astype(jnp.float32)            # (1, S) additive key-padding mask
    outs = []
    for h in range(nhead):                              # static unroll over heads
        q = qkv[:, h * Dh:(h + 1) * Dh]                 # (S, Dh)
        k = qkv[:, D + h * Dh:D + (h + 1) * Dh]
        v = qkv[:, 2 * D + h * Dh:2 * D + (h + 1) * Dh]
        s = jax.lax.dot_general(q, k, (((1,), (1,)), ((), ())),
                                preferred_element_type=jnp.float32)   # q @ k^T, (S, S)
        s = s * scale + mask                            # mask broadcasts over query rows
        s = s - jnp.max(s, axis=-1, keepdims=True)
        p = jnp.exp(s)
        denom = jnp.sum(p, axis=-1, keepdims=True)
        p = p * pl.reciprocal(denom, approx=True)       # EUP slot; frees VALU in epilogue
        outs.append(jnp.dot(p.astype(v.dtype), v,
                            preferred_element_type=jnp.float32))
    # single lane-dense (S, D) store instead of per-head masked partial stores
    o_ref[...] = jnp.concatenate(outs, axis=-1).astype(o_ref.dtype)


def mha_attention(qkv, mask_add, *, nhead):
    """softmax(q k^T / sqrt(Dh) + mask) v for all heads of one batch per grid step.

    qkv: [B, S, 3*D] (fused in-proj output, no head transposes), mask_add: [B, 1, S].
    """
    # TODO(synk): for very long sequences, switch to kv-tiled online-softmax (flash-style);
    # model_max_length=512 keeps the whole (S, 3D)/(S, S) working set comfortably in VMEM.
    B, S, D3 = qkv.shape
    D = D3 // 3
    Dh = D // nhead
    return pl.pallas_call(
        functools.partial(_mha_kernel, nhead=nhead, scale=1.0 / (Dh ** 0.5)),
        out_shape=jax.ShapeDtypeStruct((B, S, D), qkv.dtype),
        grid=(B,),
        in_specs=[
            pl.BlockSpec((None, S, D3), lambda b: (b, 0, 0)),
            pl.BlockSpec((None, 1, S), lambda b: (b, 0, 0)),
        ],
        out_specs=pl.BlockSpec((None, S, D), lambda b: (b, 0, 0)),
        compiler_params=pltpu.CompilerParams(
            dimension_semantics=("parallel",),
            vmem_limit_bytes=VMEM_LIMIT,
        ),
    )(qkv, mask_add)


# --------------------------- model (glue in JAX) ----------------------------

def encoder_layer(p, x, mask_add, *, nhead):
    """Post-norm nn.TransformerEncoderLayer (eval mode, ReLU activation)."""
    B, S, D = x.shape
    xf = x.reshape(B * S, D)

    # self-attention block
    qkv = linear(xf, p["in_proj_w"], p["in_proj_b"])               # (B*S, 3D)
    attn = mha_attention(qkv.reshape(B, S, 3 * D), mask_add, nhead=nhead)   # (B, S, D)
    attn = linear(attn.reshape(B * S, D), p["out_proj_w"], p["out_proj_b"])
    x1 = add_layernorm(xf, attn, p["ln1_g"], p["ln1_b"])           # norm1(x + sa(x)), fused add

    # feed-forward block
    # TODO(synk): fuse FF1(+ReLU)+FF2 into one pallas_call keeping the dim_ff-wide
    # intermediate in VMEM scratch to save the largest activation's HBM round-trip.
    ff = linear(x1, p["ff1_w"], p["ff1_b"], activation="relu")
    ff = linear(ff, p["ff2_w"], p["ff2_b"])
    x2 = add_layernorm(x1, ff, p["ln2_g"], p["ln2_b"])             # norm2(x + ff(x)), fused add
    return x2.reshape(B, S, D)


def transformer_qa_forward(params, input_ids, attention_mask=None, *, nhead):
    B, S = input_ids.shape
    D = params["embedding"].shape[1]

    # embedding lookup + positional encoding (gather/add glue stays in JAX)
    x = (params["embedding"][input_ids] + params["pos_enc"][:, :S, :]).astype(COMPUTE_DTYPE)

    # key_padding_mask = (attention_mask == 0) -> additive -1e9 mask on keys
    if attention_mask is not None:
        mask_add = jnp.where(attention_mask == 0, -1e9, 0.0).astype(jnp.float32)
    else:
        mask_add = jnp.zeros((B, S), jnp.float32)
    mask_add = mask_add[:, None, :]                                # (B, 1, S)

    for lp in params["layers"]:
        x = encoder_layer(lp, x, mask_add, nhead=nhead)

    # dropout(p=0.1) in eval mode is identity.
    # QA head: a 2-wide output forces masked partial stores; pad to 128 output lanes
    # so the Pallas store is lane-dense, then slice the two logit planes outside.
    qa_w = jnp.pad(params["qa_w"], ((0, 0), (0, 128 - params["qa_w"].shape[1])))
    qa_b = jnp.pad(params["qa_b"], (0, 128 - params["qa_b"].shape[0]))
    logits = linear(x.reshape(B * S, D), qa_w, qa_b)[:, :2]
    logits = logits.reshape(B, S, 2).astype(jnp.float32)
    return logits[..., 0], logits[..., 1]


# ------------------------------ param init ----------------------------------

def init_params(key, vocab_size, d_model, nhead, num_layers, dim_ff):
    del nhead  # head count is passed to the forward fn as a static argument
    def nrm(k, shape, scale=0.02):
        return (scale * jax.random.normal(k, shape)).astype(jnp.float32)

    keys = jax.random.split(key, 2 + num_layers)
    params = {
        "embedding": nrm(keys[0], (vocab_size, d_model)),
        "pos_enc": jnp.zeros((1, 512, d_model), jnp.float32),  # matches torch.zeros init
        "qa_w": nrm(keys[1], (d_model, 2)),
        "qa_b": jnp.zeros((2,), jnp.float32),
        "layers": [],
    }
    for li in range(num_layers):
        lk = jax.random.split(keys[2 + li], 4)
        params["layers"].append({
            "in_proj_w": nrm(lk[0], (d_model, 3 * d_model)),
            "in_proj_b": jnp.zeros((3 * d_model,), jnp.float32),
            "out_proj_w": nrm(lk[1], (d_model, d_model)),
            "out_proj_b": jnp.zeros((d_model,), jnp.float32),
            "ln1_g": jnp.ones((d_model,), jnp.float32),
            "ln1_b": jnp.zeros((d_model,), jnp.float32),
            "ff1_w": nrm(lk[2], (d_model, dim_ff)),
            "ff1_b": jnp.zeros((dim_ff,), jnp.float32),
            "ff2_w": nrm(lk[3], (dim_ff, d_model)),
            "ff2_b": jnp.zeros((d_model,), jnp.float32),
            "ln2_g": jnp.ones((d_model,), jnp.float32),
            "ln2_b": jnp.zeros((d_model,), jnp.float32),
        })
    return params


def to_compute_dtype(params, dtype=COMPUTE_DTYPE):
    """Cast floating-point params to the bf16 compute dtype (f32 accumulation in-kernel)."""
    def cast(a):
        if isinstance(a, jax.Array) and jnp.issubdtype(a.dtype, jnp.floating):
            return a.astype(dtype)
        return a
    return jax.tree_util.tree_map(cast, params)


# ---------------------------------- main -------------------------------------

if __name__ == "__main__":
    # small config consistent with the module (scaled down from 256/8/4/len(tokenizer))
    VOCAB, D_MODEL, NHEAD, NUM_LAYERS, DIM_FF = 100, 32, 4, 2, 64
    B, S = 2, 8

    key = jax.random.PRNGKey(0)
    pkey, ikey = jax.random.split(key)
    params = to_compute_dtype(
        init_params(pkey, VOCAB, D_MODEL, NHEAD, NUM_LAYERS, DIM_FF))

    input_ids = jax.random.randint(ikey, (B, S), 0, VOCAB, dtype=jnp.int32)
    # second sequence has 2 padded (masked-out) trailing positions
    attention_mask = jnp.array(
        [[1, 1, 1, 1, 1, 1, 1, 1],
         [1, 1, 1, 1, 1, 1, 0, 0]], dtype=jnp.int32)

    fwd = jax.jit(functools.partial(transformer_qa_forward, nhead=NHEAD))
    start_logits, end_logits = fwd(params, input_ids, attention_mask)
    jax.block_until_ready((start_logits, end_logits))

    assert start_logits.shape == (B, S) and end_logits.shape == (B, S)
    assert jnp.all(jnp.isfinite(start_logits)) and jnp.all(jnp.isfinite(end_logits))
    print("KERNEL_OK")
</pallas_src>

<mosaic_0001>
module attributes {stable_mosaic.version = 11 : i64} {
  func.func @_linear_kernel(%arg0: i32, %arg1: i32, %arg2: i32, %arg3: memref<16x32xbf16, #tpu.memory_space<vmem>>, %arg4: memref<32x96xbf16, #tpu.memory_space<vmem>>, %arg5: memref<1x96xbf16, #tpu.memory_space<vmem>>, %arg6: memref<16x96xbf16, #tpu.memory_space<vmem>>, %arg7: memref<16x96xf32, #tpu.memory_space<vmem>>) attributes {dimension_semantics = [#tpu.dimension_semantics<parallel>, #tpu.dimension_semantics<parallel>, #tpu.dimension_semantics<arbitrary>], iteration_bounds = array<i64: 1, 1, 1>, scalar_prefetch = 0 : i64, scratch_operands = 1 : i64, tpu.core_type = #tpu.core_type<tc>, window_params = [{transform_indices = @transform_0, window_bounds = array<i64: 16, 32>}, {transform_indices = @transform_1, window_bounds = array<i64: 32, 96>}, {transform_indices = @transform_2, window_bounds = array<i64: 1, 96>}, {transform_indices = @transform_3, window_bounds = array<i64: 16, 96>}]} {
    %c0_i32 = arith.constant 0 : i32
    %0 = arith.cmpi eq, %arg2, %c0_i32 : i32
    %1 = arith.extui %0 : i1 to i32
    %c0_i32_0 = arith.constant 0 : i32
    %2 = arith.cmpi ne, %1, %c0_i32_0 : i32
    scf.if %2 {
      %cst_10 = arith.constant 0.000000e+00 : f32
      %12 = vector.broadcast %cst_10 : f32 to vector<16x96xf32>
      %c0_11 = arith.constant 0 : index
      %c0_12 = arith.constant 0 : index
      %13 = vector.load %arg7[%c0_11, %c0_12] : memref<16x96xf32, #tpu.memory_space<vmem>>, vector<16x96xf32>
      tpu.vector_store %arg7[%c0_11, %c0_12], %12 {strides = array<i32>} : memref<16x96xf32, #tpu.memory_space<vmem>>, vector<16x96xf32>,
    } else {
    }
    %c0 = arith.constant 0 : index
    %c0_1 = arith.constant 0 : index
    %3 = vector.load %arg7[%c0, %c0_1] : memref<16x96xf32, #tpu.memory_space<vmem>>, vector<16x96xf32>
    %c0_2 = arith.constant 0 : index
    %c0_3 = arith.constant 0 : index
    %4 = vector.load %arg3[%c0_2, %c0_3] : memref<16x32xbf16, #tpu.memory_space<vmem>>, vector<16x32xbf16>
    %c0_4 = arith.constant 0 : index
    %c0_5 = arith.constant 0 : index
    %5 = vector.load %arg4[%c0_4, %c0_5] : memref<32x96xbf16, #tpu.memory_space<vmem>>, vector<32x96xbf16>
    %cst = arith.constant dense<0.000000e+00> : vector<16x96xf32>
    %6 = tpu.matmul %4, %5, %cst {dimension_numbers = #tpu.dot_dimension_numbers<[1], [0], [0], [1], [0, 0, 1, 1], [], []>} : vector<16x32xbf16>, vector<32x96xbf16>, vector<16x96xf32> -> vector<16x96xf32>
    %7 = arith.addf %3, %6 : vector<16x96xf32>
    %c0_6 = arith.constant 0 : index
    %c0_7 = arith.constant 0 : index
    %8 = vector.load %arg7[%c0_6, %c0_7] : memref<16x96xf32, #tpu.memory_space<vmem>>, vector<16x96xf32>
    tpu.vector_store %arg7[%c0_6, %c0_7], %7 {strides = array<i32>} : memref<16x96xf32, #tpu.memory_space<vmem>>, vector<16x96xf32>,
    %c0_i32_8 = arith.constant 0 : i32
    %9 = arith.cmpi eq, %arg2, %c0_i32_8 : i32
    %10 = arith.extui %9 : i1 to i32
    %c0_i32_9 = arith.constant 0 : i32
    %11 = arith.cmpi ne, %10, %c0_i32_9 : i32
    scf.if %11 {
      %c0_10 = arith.constant 0 : index
      %c0_11 = arith.constant 0 : index
      %12 = vector.load %arg7[%c0_10, %c0_11] : memref<16x96xf32, #tpu.memory_space<vmem>>, vector<16x96xf32>
      %c0_12 = arith.constant 0 : index
      %c0_13 = arith.constant 0 : index
      %13 = vector.load %arg5[%c0_12, %c0_13] : memref<1x96xbf16, #tpu.memory_space<vmem>>, vector<1x96xbf16>
      %14 = arith.extf %13 : vector<1x96xbf16> to vector<1x96xf32>
      %15 = vector.broadcast %14 : vector<1x96xf32> to vector<16x96xf32>
      %16 = arith.addf %12, %15 : vector<16x96xf32>
      %17 = arith.truncf %16 : vector<16x96xf32> to vector<16x96xbf16>
      %c0_14 = arith.constant 0 : index
      %c0_15 = arith.constant 0 : index
      %18 = vector.load %arg6[%c0_14, %c0_15] : memref<16x96xbf16, #tpu.memory_space<vmem>>, vector<16x96xbf16>
      tpu.vector_store %arg6[%c0_14, %c0_15], %17 {strides = array<i32>} : memref<16x96xbf16, #tpu.memory_space<vmem>>, vector<16x96xbf16>,
    } else {
    }
    return
  }
  func.func @transform_0(%arg0: i32, %arg1: i32, %arg2: i32) -> (i32, i32) {
    %c0_i32 = arith.constant 0 : i32
    return %arg0, %arg2 : i32, i32
  }
  func.func @transform_1(%arg0: i32, %arg1: i32, %arg2: i32) -> (i32, i32) {
    %c0_i32 = arith.constant 0 : i32
    return %arg2, %arg1 : i32, i32
  }
  func.func @transform_2(%arg0: i32, %arg1: i32, %arg2: i32) -> (i32, i32) {
    %c0_i32 = arith.constant 0 : i32
    %c0_i32_0 = arith.constant 0 : i32
    return %c0_i32, %arg1 : i32, i32
  }
  func.func @transform_3(%arg0: i32, %arg1: i32, %arg2: i32) -> (i32, i32) {
    %c0_i32 = arith.constant 0 : i32
    return %arg0, %arg1 : i32, i32
  }
}

module attributes {stable_mosaic.version = 11 : i64} {
  func.func @_linear_kernel(%arg0: i32, %arg1: i32, %arg2: i32, %arg3: memref<16x32xbf16, #tpu.memory_space<vmem>>, %arg4: memref<32x32xbf16, #tpu.memory_space<vmem>>, %arg5: memref<1x32xbf16, #tpu.memory_space<vmem>>, %arg6: memref<16x32xbf16, #tpu.memory_space<vmem>>, %arg7: memref<16x32xf32, #tpu.memory_space<vmem>>) attributes {dimension_semantics = [#tpu.dimension_semantics<parallel>, #tpu.dimension_semantics<parallel>, #tpu.dimension_semantics<arbitrary>], iteration_bounds = array<i64: 1, 1, 1>, scalar_prefetch = 0 : i64, scratch_operands = 1 : i64, tpu.core_type = #tpu.core_type<tc>, window_params = [{transform_indices = @transform_0, window_bounds = array<i64: 16, 32>}, {transform_indices = @transform_1, window_bounds = array<i64: 32, 32>}, {transform_indices = @transform_2, window_bounds = array<i64: 1, 32>}, {transform_indices = @transform_3, window_bounds = array<i64: 16, 32>}]} {
    %c0_i32 = arith.constant 0 : i32
    %0 = arith.cmpi eq, %arg2, %c0_i32 : i32
    %1 = arith.extui %0 : i1 to i32
    %c0_i32_0 = arith.constant 0 : i32
    %2 = arith.cmpi ne, %1, %c0_i32_0 : i32
    scf.if %2 {
      %cst_10 = arith.constant 0.000000e+00 : f32
      %12 = vector.broadcast %cst_10 : f32 to vector<16x32xf32>
      %c0_11 = arith.constant 0 : index
      %c0_12 = arith.constant 0 : index
      %13 = vector.load %arg7[%c0_11, %c0_12] : memref<16x32xf32, #tpu.memory_space<vmem>>, vector<16x32xf32>
      tpu.vector_store %arg7[%c0_11, %c0_12], %12 {strides = array<i32>} : memref<16x32xf32, #tpu.memory_space<vmem>>, vector<16x32xf32>,
    } else {
    }
    %c0 = arith.constant 0 : index
    %c0_1 = arith.constant 0 : index
    %3 = vector.load %arg7[%c0, %c0_1] : memref<16x32xf32, #tpu.memory_space<vmem>>, vector<16x32xf32>
    %c0_2 = arith.constant 0 : index
    %c0_3 = arith.constant 0 : index
    %4 = vector.load %arg3[%c0_2, %c0_3] : memref<16x32xbf16, #tpu.memory_space<vmem>>, vector<16x32xbf16>
    %c0_4 = arith.constant 0 : index
    %c0_5 = arith.constant 0 : index
    %5 = vector.load %arg4[%c0_4, %c0_5] : memref<32x32xbf16, #tpu.memory_space<vmem>>, vector<32x32xbf16>
    %cst = arith.constant dense<0.000000e+00> : vector<16x32xf32>
    %6 = tpu.matmul %4, %5, %cst {dimension_numbers = #tpu.dot_dimension_numbers<[1], [0], [0], [1], [0, 0, 1, 1], [], []>} : vector<16x32xbf16>, vector<32x32xbf16>, vector<16x32xf32> -> vector<16x32xf32>
    %7 = arith.addf %3, %6 : vector<16x32xf32>
    %c0_6 = arith.constant 0 : index
    %c0_7 = arith.constant 0 : index
    %8 = vector.load %arg7[%c0_6, %c0_7] : memref<16x32xf32, #tpu.memory_space<vmem>>, vector<16x32xf32>
    tpu.vector_store %arg7[%c0_6, %c0_7], %7 {strides = array<i32>} : memref<16x32xf32, #tpu.memory_space<vmem>>, vector<16x32xf32>,
    %c0_i32_8 = arith.constant 0 : i32
    %9 = arith.cmpi eq, %arg2, %c0_i32_8 : i32
    %10 = arith.extui %9 : i1 to i32
    %c0_i32_9 = arith.constant 0 : i32
    %11 = arith.cmpi ne, %10, %c0_i32_9 : i32
    scf.if %11 {
      %c0_10 = arith.constant 0 : index
      %c0_11 = arith.constant 0 : index
      %12 = vector.load %arg7[%c0_10, %c0_11] : memref<16x32xf32, #tpu.memory_space<vmem>>, vector<16x32xf32>
      %c0_12 = arith.constant 0 : index
      %c0_13 = arith.constant 0 : index
      %13 = vector.load %arg5[%c0_12, %c0_13] : memref<1x32xbf16, #tpu.memory_space<vmem>>, vector<1x32xbf16>
      %14 = arith.extf %13 : vector<1x32xbf16> to vector<1x32xf32>
      %15 = vector.broadcast %14 : vector<1x32xf32> to vector<16x32xf32>
      %16 = arith.addf %12, %15 : vector<16x32xf32>
      %17 = arith.truncf %16 : vector<16x32xf32> to vector<16x32xbf16>
      %c0_14 = arith.constant 0 : index
      %c0_15 = arith.constant 0 : index
      %18 = vector.load %arg6[%c0_14, %c0_15] : memref<16x32xbf16, #tpu.memory_space<vmem>>, vector<16x32xbf16>
      tpu.vector_store %arg6[%c0_14, %c0_15], %17 {strides = array<i32>} : memref<16x32xbf16, #tpu.memory_space<vmem>>, vector<16x32xbf16>,
    } else {
    }
    return
  }
  func.func @transform_0(%arg0: i32, %arg1: i32, %arg2: i32) -> (i32, i32) {
    %c0_i32 = arith.constant 0 : i32
    return %arg0, %arg2 : i32, i32
  }
  func.func @transform_1(%arg0: i32, %arg1: i32, %arg2: i32) -> (i32, i32) {
    %c0_i32 = arith.constant 0 : i32
    return %arg2, %arg1 : i32, i32
  }
  func.func @transform_2(%arg0: i32, %arg1: i32, %arg2: i32) -> (i32, i32) {
    %c0_i32 = arith.constant 0 : i32
    %c0_i32_0 = arith.constant 0 : i32
    return %c0_i32, %arg1 : i32, i32
  }
  func.func @transform_3(%arg0: i32, %arg1: i32, %arg2: i32) -> (i32, i32) {
    %c0_i32 = arith.constant 0 : i32
    return %arg0, %arg1 : i32, i32
  }
}

module attributes {stable_mosaic.version = 11 : i64} {
  func.func @_mha_kernel(%arg0: i32, %arg1: memref<1x8x96xbf16, #tpu.memory_space<vmem>>, %arg2: memref<1x1x8xf32, #tpu.memory_space<vmem>>, %arg3: memref<1x8x32xbf16, #tpu.memory_space<vmem>>) attributes {dimension_semantics = [#tpu.dimension_semantics<parallel>], iteration_bounds = array<i64: 2>, scalar_prefetch = 0 : i64, scratch_operands = 0 : i64, tpu.core_type = #tpu.core_type<tc>, window_params = [{transform_indices = @transform_0, window_bounds = array<i64: 1, 8, 96>}, {transform_indices = @transform_1, window_bounds = array<i64: 1, 1, 8>}, {transform_indices = @transform_2, window_bounds = array<i64: 1, 8, 32>}]} {
    %c0 = arith.constant 0 : index
    %c0_0 = arith.constant 0 : index
    %c0_1 = arith.constant 0 : index
    %0 = vector.load %arg1[%c0, %c0_0, %c0_1] : memref<1x8x96xbf16, #tpu.memory_space<vmem>>, vector<1x8x96xbf16>
    %1 = vector.shape_cast %0 : vector<1x8x96xbf16> to vector<8x96xbf16>
    %c0_2 = arith.constant 0 : index
    %c0_3 = arith.constant 0 : index
    %c0_4 = arith.constant 0 : index
    %2 = vector.load %arg2[%c0_2, %c0_3, %c0_4] : memref<1x1x8xf32, #tpu.memory_space<vmem>>, vector<1x1x8xf32>
    %3 = vector.shape_cast %2 : vector<1x1x8xf32> to vector<1x8xf32>
    %4 = vector.extract_strided_slice %1 {offsets = [0, 0], sizes = [8, 8], strides = [1, 1]} : vector<8x96xbf16> to vector<8x8xbf16>
    %5 = vector.extract_strided_slice %1 {offsets = [0, 32], sizes = [8, 8], strides = [1, 1]} : vector<8x96xbf16> to vector<8x8xbf16>
    %6 = vector.extract_strided_slice %1 {offsets = [0, 64], sizes = [8, 8], strides = [1, 1]} : vector<8x96xbf16> to vector<8x8xbf16>
    %cst = arith.constant dense<0.000000e+00> : vector<8x8xf32>
    %7 = tpu.matmul %4, %5, %cst {dimension_numbers = #tpu.dot_dimension_numbers<[1], [1], [0], [0], [0, 0, 1, 0], [], []>} : vector<8x8xbf16>, vector<8x8xbf16>, vector<8x8xf32> -> vector<8x8xf32>
    %cst_5 = arith.constant 0.353553385 : f32
    %8 = vector.broadcast %cst_5 : f32 to vector<8x8xf32>
    %9 = arith.mulf %7, %8 : vector<8x8xf32>
    %10 = vector.broadcast %3 : vector<1x8xf32> to vector<8x8xf32>
    %11 = arith.addf %9, %10 : vector<8x8xf32>
    %cst_6 = arith.constant dense<0xFF800000> : vector<8xf32>
    %12 = vector.multi_reduction <maximumf>, %11, %cst_6 [1] : vector<8x8xf32> to vector<8xf32>
    %13 = vector.shape_cast %12 : vector<8xf32> to vector<8x1xf32>
    %14 = vector.broadcast %13 : vector<8x1xf32> to vector<8x8xf32>
    %15 = arith.subf %11, %14 : vector<8x8xf32>
    %16 = math.exp %15 : vector<8x8xf32>
    %cst_7 = arith.constant dense<0.000000e+00> : vector<8xf32>
    %17 = vector.multi_reduction <add>, %16, %cst_7 [1] : vector<8x8xf32> to vector<8xf32>
    %18 = vector.shape_cast %17 : vector<8xf32> to vector<8x1xf32>
    %19 = tpu.reciprocal %18 {approx = true} : vector<8x1xf32> -> vector<8x1xf32>
    %20 = vector.broadcast %19 : vector<8x1xf32> to vector<8x8xf32>
    %21 = arith.mulf %16, %20 : vector<8x8xf32>
    %22 = arith.truncf %21 : vector<8x8xf32> to vector<8x8xbf16>
    %cst_8 = arith.constant dense<0.000000e+00> : vector<8x8xf32>
    %23 = tpu.matmul %22, %6, %cst_8 {dimension_numbers = #tpu.dot_dimension_numbers<[1], [0], [0], [1], [0, 0, 1, 1], [], []>} : vector<8x8xbf16>, vector<8x8xbf16>, vector<8x8xf32> -> vector<8x8xf32>
    %24 = vector.extract_strided_slice %1 {offsets = [0, 8], sizes = [8, 8], strides = [1, 1]} : vector<8x96xbf16> to vector<8x8xbf16>
    %25 = vector.extract_strided_slice %1 {offsets = [0, 40], sizes = [8, 8], strides = [1, 1]} : vector<8x96xbf16> to vector<8x8xbf16>
    %26 = vector.extract_strided_slice %1 {offsets = [0, 72], sizes = [8, 8], strides = [1, 1]} : vector<8x96xbf16> to vector<8x8xbf16>
    %cst_9 = arith.constant dense<0.000000e+00> : vector<8x8xf32>
    %27 = tpu.matmul %24, %25, %cst_9 {dimension_numbers = #tpu.dot_dimension_numbers<[1], [1], [0], [0], [0, 0, 1, 0], [], []>} : vector<8x8xbf16>, vector<8x8xbf16>, vector<8x8xf32> -> vector<8x8xf32>
    %cst_10 = arith.constant 0.353553385 : f32
    %28 = vector.broadcast %cst_10 : f32 to vector<8x8xf32>
    %29 = arith.mulf %27, %28 : vector<8x8xf32>
    %30 = vector.broadcast %3 : vector<1x8xf32> to vector<8x8xf32>
    %31 = arith.addf %29, %30 : vector<8x8xf32>
    %cst_11 = arith.constant dense<0xFF800000> : vector<8xf32>
    %32 = vector.multi_reduction <maximumf>, %31, %cst_11 [1] : vector<8x8xf32> to vector<8xf32>
    %33 = vector.shape_cast %32 : vector<8xf32> to vector<8x1xf32>
    %34 = vector.broadcast %33 : vector<8x1xf32> to vector<8x8xf32>
    %35 = arith.subf %31, %34 : vector<8x8xf32>
    %36 = math.exp %35 : vector<8x8xf32>
    %cst_12 = arith.constant dense<0.000000e+00> : vector<8xf32>
    %37 = vector.multi_reduction <add>, %36, %cst_12 [1] : vector<8x8xf32> to vector<8xf32>
    %38 = vector.shape_cast %37 : vector<8xf32> to vector<8x1xf32>
    %39 = tpu.reciprocal %38 {approx = true} : vector<8x1xf32> -> vector<8x1xf32>
    %40 = vector.broadcast %39 : vector<8x1xf32> to vector<8x8xf32>
    %41 = arith.mulf %36, %40 : vector<8x8xf32>
    %42 = arith.truncf %41 : vector<8x8xf32> to vector<8x8xbf16>
    %cst_13 = arith.constant dense<0.000000e+00> : vector<8x8xf32>
    %43 = tpu.matmul %42, %26, %cst_13 {dimension_numbers = #tpu.dot_dimension_numbers<[1], [0], [0], [1], [0, 0, 1, 1], [], []>} : vector<8x8xbf16>, vector<8x8xbf16>, vector<8x8xf32> -> vector<8x8xf32>
    %44 = vector.extract_strided_slice %1 {offsets = [0, 16], sizes = [8, 8], strides = [1, 1]} : vector<8x96xbf16> to vector<8x8xbf16>
    %45 = vector.extract_strided_slice %1 {offsets = [0, 48], sizes = [8, 8], strides = [1, 1]} : vector<8x96xbf16> to vector<8x8xbf16>
    %46 = vector.extract_strided_slice %1 {offsets = [0, 80], sizes = [8, 8], strides = [1, 1]} : vector<8x96xbf16> to vector<8x8xbf16>
    %cst_14 = arith.constant dense<0.000000e+00> : vector<8x8xf32>
    %47 = tpu.matmul %44, %45, %cst_14 {dimension_numbers = #tpu.dot_dimension_numbers<[1], [1], [0], [0], [0, 0, 1, 0], [], []>} : vector<8x8xbf16>, vector<8x8xbf16>, vector<8x8xf32> -> vector<8x8xf32>
    %cst_15 = arith.constant 0.353553385 : f32
    %48 = vector.broadcast %cst_15 : f32 to vector<8x8xf32>
    %49 = arith.mulf %47, %48 : vector<8x8xf32>
    %50 = vector.broadcast %3 : vector<1x8xf32> to vector<8x8xf32>
    %51 = arith.addf %49, %50 : vector<8x8xf32>
    %cst_16 = arith.constant dense<0xFF800000> : vector<8xf32>
    %52 = vector.multi_reduction <maximumf>, %51, %cst_16 [1] : vector<8x8xf32> to vector<8xf32>
    %53 = vector.shape_cast %52 : vector<8xf32> to vector<8x1xf32>
    %54 = vector.broadcast %53 : vector<8x1xf32> to vector<8x8xf32>
    %55 = arith.subf %51, %54 : vector<8x8xf32>
    %56 = math.exp %55 : vector<8x8xf32>
    %cst_17 = arith.constant dense<0.000000e+00> : vector<8xf32>
    %57 = vector.multi_reduction <add>, %56, %cst_17 [1] : vector<8x8xf32> to vector<8xf32>
    %58 = vector.shape_cast %57 : vector<8xf32> to vector<8x1xf32>
    %59 = tpu.reciprocal %58 {approx = true} : vector<8x1xf32> -> vector<8x1xf32>
    %60 = vector.broadcast %59 : vector<8x1xf32> to vector<8x8xf32>
    %61 = arith.mulf %56, %60 : vector<8x8xf32>
    %62 = arith.truncf %61 : vector<8x8xf32> to vector<8x8xbf16>
    %cst_18 = arith.constant dense<0.000000e+00> : vector<8x8xf32>
    %63 = tpu.matmul %62, %46, %cst_18 {dimension_numbers = #tpu.dot_dimension_numbers<[1], [0], [0], [1], [0, 0, 1, 1], [], []>} : vector<8x8xbf16>, vector<8x8xbf16>, vector<8x8xf32> -> vector<8x8xf32>
    %64 = vector.extract_strided_slice %1 {offsets = [0, 24], sizes = [8, 8], strides = [1, 1]} : vector<8x96xbf16> to vector<8x8xbf16>
    %65 = vector.extract_strided_slice %1 {offsets = [0, 56], sizes = [8, 8], strides = [1, 1]} : vector<8x96xbf16> to vector<8x8xbf16>
    %66 = vector.extract_strided_slice %1 {offsets = [0, 88], sizes = [8, 8], strides = [1, 1]} : vector<8x96xbf16> to vector<8x8xbf16>
    %cst_19 = arith.constant dense<0.000000e+00> : vector<8x8xf32>
    %67 = tpu.matmul %64, %65, %cst_19 {dimension_numbers = #tpu.dot_dimension_numbers<[1], [1], [0], [0], [0, 0, 1, 0], [], []>} : vector<8x8xbf16>, vector<8x8xbf16>, vector<8x8xf32> -> vector<8x8xf32>
    %cst_20 = arith.constant 0.353553385 : f32
    %68 = vector.broadcast %cst_20 : f32 to vector<8x8xf32>
    %69 = arith.mulf %67, %68 : vector<8x8xf32>
    %70 = vector.broadcast %3 : vector<1x8xf32> to vector<8x8xf32>
    %71 = arith.addf %69, %70 : vector<8x8xf32>
    %cst_21 = arith.constant dense<0xFF800000> : vector<8xf32>
    %72 = vector.multi_reduction <maximumf>, %71, %cst_21 [1] : vector<8x8xf32> to vector<8xf32>
    %73 = vector.shape_cast %72 : vector<8xf32> to vector<8x1xf32>
    %74 = vector.broadcast %73 : vector<8x1xf32> to vector<8x8xf32>
    %75 = arith.subf %71, %74 : vector<8x8xf32>
    %76 = math.exp %75 : vector<8x8xf32>
    %cst_22 = arith.constant dense<0.000000e+00> : vector<8xf32>
    %77 = vector.multi_reduction <add>, %76, %cst_22 [1] : vector<8x8xf32> to vector<8xf32>
    %78 = vector.shape_cast %77 : vector<8xf32> to vector<8x1xf32>
    %79 = tpu.reciprocal %78 {approx = true} : vector<8x1xf32> -> vector<8x1xf32>
    %80 = vector.broadcast %79 : vector<8x1xf32> to vector<8x8xf32>
    %81 = arith.mulf %76, %80 : vector<8x8xf32>
    %82 = arith.truncf %81 : vector<8x8xf32> to vector<8x8xbf16>
    %cst_23 = arith.constant dense<0.000000e+00> : vector<8x8xf32>
    %83 = tpu.matmul %82, %66, %cst_23 {dimension_numbers = #tpu.dot_dimension_numbers<[1], [0], [0], [1], [0, 0, 1, 1], [], []>} : vector<8x8xbf16>, vector<8x8xbf16>, vector<8x8xf32> -> vector<8x8xf32>
    %84 = tpu.concatenate %23, %43, %63, %83 in 1 : vector<8x8xf32>, vector<8x8xf32>, vector<8x8xf32>, vector<8x8xf32> -> vector<8x32xf32>
    %85 = arith.truncf %84 : vector<8x32xf32> to vector<8x32xbf16>
    %c0_24 = arith.constant 0 : index
    %c0_25 = arith.constant 0 : index
    %c0_26 = arith.constant 0 : index
    %86 = vector.load %arg3[%c0_24, %c0_25, %c0_26] : memref<1x8x32xbf16, #tpu.memory_space<vmem>>, vector<1x8x32xbf16>
    %87 = vector.shape_cast %86 : vector<1x8x32xbf16> to vector<8x32xbf16>
    %88 = vector.shape_cast %85 : vector<8x32xbf16> to vector<1x8x32xbf16>
    tpu.vector_store %arg3[%c0_24, %c0_25, %c0_26], %88 {strides = array<i32>} : memref<1x8x32xbf16, #tpu.memory_space<vmem>>, vector<1x8x32xbf16>,
    return
  }
  func.func @transform_0(%arg0: i32) -> (i32, i32, i32) {
    %c0_i32 = arith.constant 0 : i32
    %c0_i32_0 = arith.constant 0 : i32
    %c0_i32_1 = arith.constant 0 : i32
    return %arg0, %c0_i32, %c0_i32_0 : i32, i32, i32
  }
  func.func @transform_1(%arg0: i32) -> (i32, i32, i32) {
    %c0_i32 = arith.constant 0 : i32
    %c0_i32_0 = arith.constant 0 : i32
    %c0_i32_1 = arith.constant 0 : i32
    return %arg0, %c0_i32, %c0_i32_0 : i32, i32, i32
  }
  func.func @transform_2(%arg0: i32) -> (i32, i32, i32) {
    %c0_i32 = arith.constant 0 : i32
    %c0_i32_0 = arith.constant 0 : i32
    %c0_i32_1 = arith.constant 0 : i32
    return %arg0, %c0_i32, %c0_i32_0 : i32, i32, i32
  }
}

module attributes {stable_mosaic.version = 11 : i64} {
  func.func @_add_layernorm_kernel(%arg0: i32, %arg1: memref<16x32xbf16, #tpu.memory_space<vmem>>, %arg2: memref<16x32xbf16, #tpu.memory_space<vmem>>, %arg3: memref<1x32xbf16, #tpu.memory_space<vmem>>, %arg4: memref<1x32xbf16, #tpu.memory_space<vmem>>, %arg5: memref<16x32xbf16, #tpu.memory_space<vmem>>) attributes {dimension_semantics = [#tpu.dimension_semantics<parallel>], iteration_bounds = array<i64: 1>, scalar_prefetch = 0 : i64, scratch_operands = 0 : i64, tpu.core_type = #tpu.core_type<tc>, window_params = [{transform_indices = @transform_0, window_bounds = array<i64: 16, 32>}, {transform_indices = @transform_1, window_bounds = array<i64: 16, 32>}, {pipeline_mode = #tpu.pipeline_mode<synchronous>, transform_indices = @transform_2, window_bounds = array<i64: 1, 32>}, {pipeline_mode = #tpu.pipeline_mode<synchronous>, transform_indices = @transform_3, window_bounds = array<i64: 1, 32>}, {transform_indices = @transform_4, window_bounds = array<i64: 16, 32>}]} {
    %c0 = arith.constant 0 : index
    %c0_0 = arith.constant 0 : index
    %0 = vector.load %arg1[%c0, %c0_0] : memref<16x32xbf16, #tpu.memory_space<vmem>>, vector<16x32xbf16>
    %1 = arith.extf %0 : vector<16x32xbf16> to vector<16x32xf32>
    %c0_1 = arith.constant 0 : index
    %c0_2 = arith.constant 0 : index
    %2 = vector.load %arg2[%c0_1, %c0_2] : memref<16x32xbf16, #tpu.memory_space<vmem>>, vector<16x32xbf16>
    %3 = arith.extf %2 : vector<16x32xbf16> to vector<16x32xf32>
    %4 = arith.addf %1, %3 : vector<16x32xf32>
    %cst = arith.constant dense<0.000000e+00> : vector<16xf32>
    %5 = vector.multi_reduction <add>, %4, %cst [1] : vector<16x32xf32> to vector<16xf32>
    %6 = vector.shape_cast %5 : vector<16xf32> to vector<16x1xf32>
    %cst_3 = arith.constant 3.200000e+01 : f32
    %7 = vector.broadcast %cst_3 : f32 to vector<16x1xf32>
    %8 = arith.divf %6, %7 : vector<16x1xf32>
    %9 = vector.broadcast %8 : vector<16x1xf32> to vector<16x32xf32>
    %10 = arith.subf %4, %9 : vector<16x32xf32>
    %11 = arith.mulf %10, %10 : vector<16x32xf32>
    %cst_4 = arith.constant dense<0.000000e+00> : vector<16xf32>
    %12 = vector.multi_reduction <add>, %11, %cst_4 [1] : vector<16x32xf32> to vector<16xf32>
    %13 = vector.shape_cast %12 : vector<16xf32> to vector<16x1xf32>
    %cst_5 = arith.constant 3.200000e+01 : f32
    %14 = vector.broadcast %cst_5 : f32 to vector<16x1xf32>
    %15 = arith.divf %13, %14 : vector<16x1xf32>
    %16 = vector.broadcast %8 : vector<16x1xf32> to vector<16x32xf32>
    %17 = arith.subf %4, %16 : vector<16x32xf32>
    %cst_6 = arith.constant 9.99999974E-6 : f32
    %18 = vector.broadcast %cst_6 : f32 to vector<16x1xf32>
    %19 = arith.addf %15, %18 : vector<16x1xf32>
    %20 = math.rsqrt %19 : vector<16x1xf32>
    %21 = vector.broadcast %20 : vector<16x1xf32> to vector<16x32xf32>
    %22 = arith.mulf %17, %21 : vector<16x32xf32>
    %c0_7 = arith.constant 0 : index
    %c0_8 = arith.constant 0 : index
    %23 = vector.load %arg3[%c0_7, %c0_8] : memref<1x32xbf16, #tpu.memory_space<vmem>>, vector<1x32xbf16>
    %24 = arith.extf %23 : vector<1x32xbf16> to vector<1x32xf32>
    %25 = vector.broadcast %24 : vector<1x32xf32> to vector<16x32xf32>
    %26 = arith.mulf %22, %25 : vector<16x32xf32>
    %c0_9 = arith.constant 0 : index
    %c0_10 = arith.constant 0 : index
    %27 = vector.load %arg4[%c0_9, %c0_10] : memref<1x32xbf16, #tpu.memory_space<vmem>>, vector<1x32xbf16>
    %28 = arith.extf %27 : vector<1x32xbf16> to vector<1x32xf32>
    %29 = vector.broadcast %28 : vector<1x32xf32> to vector<16x32xf32>
    %30 = arith.addf %26, %29 : vector<16x32xf32>
    %31 = arith.truncf %30 : vector<16x32xf32> to vector<16x32xbf16>
    %c0_11 = arith.constant 0 : index
    %c0_12 = arith.constant 0 : index
    %32 = vector.load %arg5[%c0_11, %c0_12] : memref<16x32xbf16, #tpu.memory_space<vmem>>, vector<16x32xbf16>
    tpu.vector_store %arg5[%c0_11, %c0_12], %31 {strides = array<i32>} : memref<16x32xbf16, #tpu.memory_space<vmem>>, vector<16x32xbf16>,
    return
  }
  func.func @transform_0(%arg0: i32) -> (i32, i32) {
    %c0_i32 = arith.constant 0 : i32
    %c0_i32_0 = arith.constant 0 : i32
    return %arg0, %c0_i32 : i32, i32
  }
  func.func @transform_1(%arg0: i32) -> (i32, i32) {
    %c0_i32 = arith.constant 0 : i32
    %c0_i32_0 = arith.constant 0 : i32
    return %arg0, %c0_i32 : i32, i32
  }
  func.func @transform_2(%arg0: i32) -> (i32, i32) {
    %c0_i32 = arith.constant 0 : i32
    %c0_i32_0 = arith.constant 0 : i32
    %c0_i32_1 = arith.constant 0 : i32
    return %c0_i32, %c0_i32_0 : i32, i32
  }
  func.func @transform_3(%arg0: i32) -> (i32, i32) {
    %c0_i32 = arith.constant 0 : i32
    %c0_i32_0 = arith.constant 0 : i32
    %c0_i32_1 = arith.constant 0 : i32
    return %c0_i32, %c0_i32_0 : i32, i32
  }
  func.func @transform_4(%arg0: i32) -> (i32, i32) {
    %c0_i32 = arith.constant 0 : i32
    %c0_i32_0 = arith.constant 0 : i32
    return %arg0, %c0_i32 : i32, i32
  }
}

module attributes {stable_mosaic.version = 11 : i64} {
  func.func @_linear_kernel(%arg0: i32, %arg1: i32, %arg2: i32, %arg3: memref<16x32xbf16, #tpu.memory_space<vmem>>, %arg4: memref<32x64xbf16, #tpu.memory_space<vmem>>, %arg5: memref<1x64xbf16, #tpu.memory_space<vmem>>, %arg6: memref<16x64xbf16, #tpu.memory_space<vmem>>, %arg7: memref<16x64xf32, #tpu.memory_space<vmem>>) attributes {dimension_semantics = [#tpu.dimension_semantics<parallel>, #tpu.dimension_semantics<parallel>, #tpu.dimension_semantics<arbitrary>], iteration_bounds = array<i64: 1, 1, 1>, scalar_prefetch = 0 : i64, scratch_operands = 1 : i64, tpu.core_type = #tpu.core_type<tc>, window_params = [{transform_indices = @transform_0, window_bounds = array<i64: 16, 32>}, {transform_indices = @transform_1, window_bounds = array<i64: 32, 64>}, {transform_indices = @transform_2, window_bounds = array<i64: 1, 64>}, {transform_indices = @transform_3, window_bounds = array<i64: 16, 64>}]} {
    %c0_i32 = arith.constant 0 : i32
    %0 = arith.cmpi eq, %arg2, %c0_i32 : i32
    %1 = arith.extui %0 : i1 to i32
    %c0_i32_0 = arith.constant 0 : i32
    %2 = arith.cmpi ne, %1, %c0_i32_0 : i32
    scf.if %2 {
      %cst_10 = arith.constant 0.000000e+00 : f32
      %12 = vector.broadcast %cst_10 : f32 to vector<16x64xf32>
      %c0_11 = arith.constant 0 : index
      %c0_12 = arith.constant 0 : index
      %13 = vector.load %arg7[%c0_11, %c0_12] : memref<16x64xf32, #tpu.memory_space<vmem>>, vector<16x64xf32>
      tpu.vector_store %arg7[%c0_11, %c0_12], %12 {strides = array<i32>} : memref<16x64xf32, #tpu.memory_space<vmem>>, vector<16x64xf32>,
    } else {
    }
    %c0 = arith.constant 0 : index
    %c0_1 = arith.constant 0 : index
    %3 = vector.load %arg7[%c0, %c0_1] : memref<16x64xf32, #tpu.memory_space<vmem>>, vector<16x64xf32>
    %c0_2 = arith.constant 0 : index
    %c0_3 = arith.constant 0 : index
    %4 = vector.load %arg3[%c0_2, %c0_3] : memref<16x32xbf16, #tpu.memory_space<vmem>>, vector<16x32xbf16>
    %c0_4 = arith.constant 0 : index
    %c0_5 = arith.constant 0 : index
    %5 = vector.load %arg4[%c0_4, %c0_5] : memref<32x64xbf16, #tpu.memory_space<vmem>>, vector<32x64xbf16>
    %cst = arith.constant dense<0.000000e+00> : vector<16x64xf32>
    %6 = tpu.matmul %4, %5, %cst {dimension_numbers = #tpu.dot_dimension_numbers<[1], [0], [0], [1], [0, 0, 1, 1], [], []>} : vector<16x32xbf16>, vector<32x64xbf16>, vector<16x64xf32> -> vector<16x64xf32>
    %7 = arith.addf %3, %6 : vector<16x64xf32>
    %c0_6 = arith.constant 0 : index
    %c0_7 = arith.constant 0 : index
    %8 = vector.load %arg7[%c0_6, %c0_7] : memref<16x64xf32, #tpu.memory_space<vmem>>, vector<16x64xf32>
    tpu.vector_store %arg7[%c0_6, %c0_7], %7 {strides = array<i32>} : memref<16x64xf32, #tpu.memory_space<vmem>>, vector<16x64xf32>,
    %c0_i32_8 = arith.constant 0 : i32
    %9 = arith.cmpi eq, %arg2, %c0_i32_8 : i32
    %10 = arith.extui %9 : i1 to i32
    %c0_i32_9 = arith.constant 0 : i32
    %11 = arith.cmpi ne, %10, %c0_i32_9 : i32
    scf.if %11 {
      %c0_10 = arith.constant 0 : index
      %c0_11 = arith.constant 0 : index
      %12 = vector.load %arg7[%c0_10, %c0_11] : memref<16x64xf32, #tpu.memory_space<vmem>>, vector<16x64xf32>
      %c0_12 = arith.constant 0 : index
      %c0_13 = arith.constant 0 : index
      %13 = vector.load %arg5[%c0_12, %c0_13] : memref<1x64xbf16, #tpu.memory_space<vmem>>, vector<1x64xbf16>
      %14 = arith.extf %13 : vector<1x64xbf16> to vector<1x64xf32>
      %15 = vector.broadcast %14 : vector<1x64xf32> to vector<16x64xf32>
      %16 = arith.addf %12, %15 : vector<16x64xf32>
      %cst_14 = arith.constant 0.000000e+00 : f32
      %17 = vector.broadcast %cst_14 : f32 to vector<16x64xf32>
      %18 = arith.maximumf %16, %17 : vector<16x64xf32>
      %19 = arith.truncf %18 : vector<16x64xf32> to vector<16x64xbf16>
      %c0_15 = arith.constant 0 : index
      %c0_16 = arith.constant 0 : index
      %20 = vector.load %arg6[%c0_15, %c0_16] : memref<16x64xbf16, #tpu.memory_space<vmem>>, vector<16x64xbf16>
      tpu.vector_store %arg6[%c0_15, %c0_16], %19 {strides = array<i32>} : memref<16x64xbf16, #tpu.memory_space<vmem>>, vector<16x64xbf16>,
    } else {
    }
    return
  }
  func.func @transform_0(%arg0: i32, %arg1: i32, %arg2: i32) -> (i32, i32) {
    %c0_i32 = arith.constant 0 : i32
    return %arg0, %arg2 : i32, i32
  }
  func.func @transform_1(%arg0: i32, %arg1: i32, %arg2: i32) -> (i32, i32) {
    %c0_i32 = arith.constant 0 : i32
    return %arg2, %arg1 : i32, i32
  }
  func.func @transform_2(%arg0: i32, %arg1: i32, %arg2: i32) -> (i32, i32) {
    %c0_i32 = arith.constant 0 : i32
    %c0_i32_0 = arith.constant 0 : i32
    return %c0_i32, %arg1 : i32, i32
  }
  func.func @transform_3(%arg0: i32, %arg1: i32, %arg2: i32) -> (i32, i32) {
    %c0_i32 = arith.constant 0 : i32
    return %arg0, %arg1 : i32, i32
  }
}

module attributes {stable_mosaic.version = 11 : i64} {
  func.func @_linear_kernel(%arg0: i32, %arg1: i32, %arg2: i32, %arg3: memref<16x64xbf16, #tpu.memory_space<vmem>>, %arg4: memref<64x32xbf16, #tpu.memory_space<vmem>>, %arg5: memref<1x32xbf16, #tpu.memory_space<vmem>>, %arg6: memref<16x32xbf16, #tpu.memory_space<vmem>>, %arg7: memref<16x32xf32, #tpu.memory_space<vmem>>) attributes {dimension_semantics = [#tpu.dimension_semantics<parallel>, #tpu.dimension_semantics<parallel>, #tpu.dimension_semantics<arbitrary>], iteration_bounds = array<i64: 1, 1, 1>, scalar_prefetch = 0 : i64, scratch_operands = 1 : i64, tpu.core_type = #tpu.core_type<tc>, window_params = [{transform_indices = @transform_0, window_bounds = array<i64: 16, 64>}, {transform_indices = @transform_1, window_bounds = array<i64: 64, 32>}, {transform_indices = @transform_2, window_bounds = array<i64: 1, 32>}, {transform_indices = @transform_3, window_bounds = array<i64: 16, 32>}]} {
    %c0_i32 = arith.constant 0 : i32
    %0 = arith.cmpi eq, %arg2, %c0_i32 : i32
    %1 = arith.extui %0 : i1 to i32
    %c0_i32_0 = arith.constant 0 : i32
    %2 = arith.cmpi ne, %1, %c0_i32_0 : i32
    scf.if %2 {
      %cst_10 = arith.constant 0.000000e+00 : f32
      %12 = vector.broadcast %cst_10 : f32 to vector<16x32xf32>
      %c0_11 = arith.constant 0 : index
      %c0_12 = arith.constant 0 : index
      %13 = vector.load %arg7[%c0_11, %c0_12] : memref<16x32xf32, #tpu.memory_space<vmem>>, vector<16x32xf32>
      tpu.vector_store %arg7[%c0_11, %c0_12], %12 {strides = array<i32>} : memref<16x32xf32, #tpu.memory_space<vmem>>, vector<16x32xf32>,
    } else {
    }
    %c0 = arith.constant 0 : index
    %c0_1 = arith.constant 0 : index
    %3 = vector.load %arg7[%c0, %c0_1] : memref<16x32xf32, #tpu.memory_space<vmem>>, vector<16x32xf32>
    %c0_2 = arith.constant 0 : index
    %c0_3 = arith.constant 0 : index
    %4 = vector.load %arg3[%c0_2, %c0_3] : memref<16x64xbf16, #tpu.memory_space<vmem>>, vector<16x64xbf16>
    %c0_4 = arith.constant 0 : index
    %c0_5 = arith.constant 0 : index
    %5 = vector.load %arg4[%c0_4, %c0_5] : memref<64x32xbf16, #tpu.memory_space<vmem>>, vector<64x32xbf16>
    %cst = arith.constant dense<0.000000e+00> : vector<16x32xf32>
    %6 = tpu.matmul %4, %5, %cst {dimension_numbers = #tpu.dot_dimension_numbers<[1], [0], [0], [1], [0, 0, 1, 1], [], []>} : vector<16x64xbf16>, vector<64x32xbf16>, vector<16x32xf32> -> vector<16x32xf32>
    %7 = arith.addf %3, %6 : vector<16x32xf32>
    %c0_6 = arith.constant 0 : index
    %c0_7 = arith.constant 0 : index
    %8 = vector.load %arg7[%c0_6, %c0_7] : memref<16x32xf32, #tpu.memory_space<vmem>>, vector<16x32xf32>
    tpu.vector_store %arg7[%c0_6, %c0_7], %7 {strides = array<i32>} : memref<16x32xf32, #tpu.memory_space<vmem>>, vector<16x32xf32>,
    %c0_i32_8 = arith.constant 0 : i32
    %9 = arith.cmpi eq, %arg2, %c0_i32_8 : i32
    %10 = arith.extui %9 : i1 to i32
    %c0_i32_9 = arith.constant 0 : i32
    %11 = arith.cmpi ne, %10, %c0_i32_9 : i32
    scf.if %11 {
      %c0_10 = arith.constant 0 : index
      %c0_11 = arith.constant 0 : index
      %12 = vector.load %arg7[%c0_10, %c0_11] : memref<16x32xf32, #tpu.memory_space<vmem>>, vector<16x32xf32>
      %c0_12 = arith.constant 0 : index
      %c0_13 = arith.constant 0 : index
      %13 = vector.load %arg5[%c0_12, %c0_13] : memref<1x32xbf16, #tpu.memory_space<vmem>>, vector<1x32xbf16>
      %14 = arith.extf %13 : vector<1x32xbf16> to vector<1x32xf32>
      %15 = vector.broadcast %14 : vector<1x32xf32> to vector<16x32xf32>
      %16 = arith.addf %12, %15 : vector<16x32xf32>
      %17 = arith.truncf %16 : vector<16x32xf32> to vector<16x32xbf16>
      %c0_14 = arith.constant 0 : index
      %c0_15 = arith.constant 0 : index
      %18 = vector.load %arg6[%c0_14, %c0_15] : memref<16x32xbf16, #tpu.memory_space<vmem>>, vector<16x32xbf16>
      tpu.vector_store %arg6[%c0_14, %c0_15], %17 {strides = array<i32>} : memref<16x32xbf16, #tpu.memory_space<vmem>>, vector<16x32xbf16>,
    } else {
    }
    return
  }
  func.func @transform_0(%arg0: i32, %arg1: i32, %arg2: i32) -> (i32, i32) {
    %c0_i32 = arith.constant 0 : i32
    return %arg0, %arg2 : i32, i32
  }
  func.func @transform_1(%arg0: i32, %arg1: i32, %arg2: i32) -> (i32, i32) {
    %c0_i32 = arith.constant 0 : i32
    return %arg2, %arg1 : i32, i32
  }
  func.func @transform_2(%arg0: i32, %arg1: i32, %arg2: i32) -> (i32, i32) {
    %c0_i32 = arith.constant 0 : i32
    %c0_i32_0 = arith.constant 0 : i32
    return %c0_i32, %arg1 : i32, i32
  }
  func.func @transform_3(%arg0: i32, %arg1: i32, %arg2: i32) -> (i32, i32) {
    %c0_i32 = arith.constant 0 : i32
    return %arg0, %arg1 : i32, i32
  }
}

module attributes {stable_mosaic.version = 11 : i64} {
  func.func @_linear_kernel(%arg0: i32, %arg1: i32, %arg2: i32, %arg3: memref<16x32xbf16, #tpu.memory_space<vmem>>, %arg4: memref<32x128xbf16, #tpu.memory_space<vmem>>, %arg5: memref<1x128xbf16, #tpu.memory_space<vmem>>, %arg6: memref<16x128xbf16, #tpu.memory_space<vmem>>, %arg7: memref<16x128xf32, #tpu.memory_space<vmem>>) attributes {dimension_semantics = [#tpu.dimension_semantics<parallel>, #tpu.dimension_semantics<parallel>, #tpu.dimension_semantics<arbitrary>], iteration_bounds = array<i64: 1, 1, 1>, scalar_prefetch = 0 : i64, scratch_operands = 1 : i64, tpu.core_type = #tpu.core_type<tc>, window_params = [{transform_indices = @transform_0, window_bounds = array<i64: 16, 32>}, {transform_indices = @transform_1, window_bounds = array<i64: 32, 128>}, {transform_indices = @transform_2, window_bounds = array<i64: 1, 128>}, {transform_indices = @transform_3, window_bounds = array<i64: 16, 128>}]} {
    %c0_i32 = arith.constant 0 : i32
    %0 = arith.cmpi eq, %arg2, %c0_i32 : i32
    %1 = arith.extui %0 : i1 to i32
    %c0_i32_0 = arith.constant 0 : i32
    %2 = arith.cmpi ne, %1, %c0_i32_0 : i32
    scf.if %2 {
      %cst_10 = arith.constant 0.000000e+00 : f32
      %12 = vector.broadcast %cst_10 : f32 to vector<16x128xf32>
      %c0_11 = arith.constant 0 : index
      %c0_12 = arith.constant 0 : index
      %13 = vector.load %arg7[%c0_11, %c0_12] : memref<16x128xf32, #tpu.memory_space<vmem>>, vector<16x128xf32>
      tpu.vector_store %arg7[%c0_11, %c0_12], %12 {strides = array<i32>} : memref<16x128xf32, #tpu.memory_space<vmem>>, vector<16x128xf32>,
    } else {
    }
    %c0 = arith.constant 0 : index
    %c0_1 = arith.constant 0 : index
    %3 = vector.load %arg7[%c0, %c0_1] : memref<16x128xf32, #tpu.memory_space<vmem>>, vector<16x128xf32>
    %c0_2 = arith.constant 0 : index
    %c0_3 = arith.constant 0 : index
    %4 = vector.load %arg3[%c0_2, %c0_3] : memref<16x32xbf16, #tpu.memory_space<vmem>>, vector<16x32xbf16>
    %c0_4 = arith.constant 0 : index
    %c0_5 = arith.constant 0 : index
    %5 = vector.load %arg4[%c0_4, %c0_5] : memref<32x128xbf16, #tpu.memory_space<vmem>>, vector<32x128xbf16>
    %cst = arith.constant dense<0.000000e+00> : vector<16x128xf32>
    %6 = tpu.matmul %4, %5, %cst {dimension_numbers = #tpu.dot_dimension_numbers<[1], [0], [0], [1], [0, 0, 1, 1], [], []>} : vector<16x32xbf16>, vector<32x128xbf16>, vector<16x128xf32> -> vector<16x128xf32>
    %7 = arith.addf %3, %6 : vector<16x128xf32>
    %c0_6 = arith.constant 0 : index
    %c0_7 = arith.constant 0 : index
    %8 = vector.load %arg7[%c0_6, %c0_7] : memref<16x128xf32, #tpu.memory_space<vmem>>, vector<16x128xf32>
    tpu.vector_store %arg7[%c0_6, %c0_7], %7 {strides = array<i32>} : memref<16x128xf32, #tpu.memory_space<vmem>>, vector<16x128xf32>,
    %c0_i32_8 = arith.constant 0 : i32
    %9 = arith.cmpi eq, %arg2, %c0_i32_8 : i32
    %10 = arith.extui %9 : i1 to i32
    %c0_i32_9 = arith.constant 0 : i32
    %11 = arith.cmpi ne, %10, %c0_i32_9 : i32
    scf.if %11 {
      %c0_10 = arith.constant 0 : index
      %c0_11 = arith.constant 0 : index
      %12 = vector.load %arg7[%c0_10, %c0_11] : memref<16x128xf32, #tpu.memory_space<vmem>>, vector<16x128xf32>
      %c0_12 = arith.constant 0 : index
      %c0_13 = arith.constant 0 : index
      %13 = vector.load %arg5[%c0_12, %c0_13] : memref<1x128xbf16, #tpu.memory_space<vmem>>, vector<1x128xbf16>
      %14 = arith.extf %13 : vector<1x128xbf16> to vector<1x128xf32>
      %15 = vector.broadcast %14 : vector<1x128xf32> to vector<16x128xf32>
      %16 = arith.addf %12, %15 : vector<16x128xf32>
      %17 = arith.truncf %16 : vector<16x128xf32> to vector<16x128xbf16>
      %c0_14 = arith.constant 0 : index
      %c0_15 = arith.constant 0 : index
      %18 = vector.load %arg6[%c0_14, %c0_15] : memref<16x128xbf16, #tpu.memory_space<vmem>>, vector<16x128xbf16>
      tpu.vector_store %arg6[%c0_14, %c0_15], %17 {strides = array<i32>} : memref<16x128xbf16, #tpu.memory_space<vmem>>, vector<16x128xbf16>,
    } else {
    }
    return
  }
  func.func @transform_0(%arg0: i32, %arg1: i32, %arg2: i32) -> (i32, i32) {
    %c0_i32 = arith.constant 0 : i32
    return %arg0, %arg2 : i32, i32
  }
  func.func @transform_1(%arg0: i32, %arg1: i32, %arg2: i32) -> (i32, i32) {
    %c0_i32 = arith.constant 0 : i32
    return %arg2, %arg1 : i32, i32
  }
  func.func @transform_2(%arg0: i32, %arg1: i32, %arg2: i32) -> (i32, i32) {
    %c0_i32 = arith.constant 0 : i32
    %c0_i32_0 = arith.constant 0 : i32
    return %c0_i32, %arg1 : i32, i32
  }
  func.func @transform_3(%arg0: i32, %arg1: i32, %arg2: i32) -> (i32, i32) {
    %c0_i32 = arith.constant 0 : i32
    return %arg0, %arg1 : i32, i32
  }
}

</mosaic_0001>

<bundles_post_ra>
// kernel: transformer_qa_forward.15
= control target key start
LH: loop header
LB: loop body
LE: loop exit
PB: predicated region body
PF: predicated region fallthrough
CT: control target
= control target key end

     0   :  { %vm19_vm0 = vcmask 785408   ;;  %v149_v0 = vmov 0.0   ;;  %vm150_vm1 = vmmov 0   ;;  %vm47_vm2 = vcmask 261120   ;;  %s193_s1 = inlined_call_operand.vmem [shape: bf16[32,96], index: 1, kind: input, shape index: {}]   ;;  %s194_s0 = inlined_call_operand.vmem [shape: bf16[16,32], index: 0, kind: input, shape index: {}]   ;;  %s195_s2 = inlined_call_operand.vmem [shape: bf16[1,96], index: 2, kind: input, shape index: {}]   ;;  %s196_s3 = inlined_call_operand.vmem [shape: bf16[16,96], index: 3, kind: output, shape index: {}]  }
   0x1   :  { %136 = vmatprep.subr.bf16.mxu0 %v149_v0  ;;  %v146_v1 = vld [vmem:[%s193_s1] sm:$0xff]   ;;  %140 = vmatprep.mubr.msk.bf16.mxu0 %vm150_vm1, %v149_v0  ;;  %20 = vst.msk [vmem:[#allocation2] sm:$0xff] %vm19_vm0, %v149_v0  ;;  %21 = vst.msk [vmem:[#allocation2 + $0x8] sm:$0xff] %vm19_vm0, %v149_v0  ;;  %v147_v2 = vld [vmem:[%s193_s1 + $0x8] sm:$0xff]   ;;  %v104_v4 = vlaneseq  ;;  %vm118_vm3 = vcmask 781312  }
   0x2   :  { %137 = vmatpush3.bf16.msra.mxu0 %v146_v1  ;;  %v148_v3 = vld [vmem:[%s194_s0] sm:$0xff]  }
   0x3   :  { %138 = vmatprep.subr.bf16.mxu0 %v149_v0  ;;  %v105_v6 = vshrl.u32 %v104_v4, 7  ;;  %v102_v8 = vld [vmem:[%s195_s2] sm:$0x1] }
   0x4   :  { %v103_v13 = vunpack.c.l.bf16 %v102_v8 }
   0x5   :  { %v106_v14 = vsub.s32 0, %v105_v6 }
   0x6   :  { %139 = vmatpush3.bf16.msra.mxu0 %v147_v2 }
   0x7   :  { %v107_v17 = vrot.slane %v103_v13, %v106_v14 }
   0x8   :  { %v22_v5 = vld [vmem:[#allocation2] sm:$0xff]  ;;  %v23_v9 = vld [vmem:[#allocation2 + $0x8] sm:$0xff] }
   0x9   :  { %141 = vmatmul.mubr.msk.bf16.vlgmr.msra.gmra.mrb[0].mxu0 %vm47_vm2, %v148_v3 }
  0xdc   :  { %v85_v7 = vpop.f32.mrb[0].mxu0 }
  0xdd   :  { %v92_v10 = vadd.f32 %v85_v7, %v22_v5  ;;  %v142_v11 = vpop.f32.mrb[1].mxu0 }
  0xde   :  { %v88_v12 = vpop.f32.mrb[2].mxu0 }
  0xdf   :  { %95 = vst.msk [vmem:[#allocation2] sm:$0xff] %vm19_vm0, %v92_v10  ;;  %v93_v15 = vadd.f32 %v88_v12, %v23_v9  ;;  %v143_v16 = vpop.f32.mrb[3].mxu0 }
  0xe1   :  { %96 = vst.msk [vmem:[#allocation2 + $0x8] sm:$0xff] %vm19_vm0, %v93_v15 }
  0xe6   :  { %v100_v18 = vld [vmem:[#allocation2] sm:$0xff] }
  0xe7   :  { %v108_v19 = vadd.f32 %v107_v17, %v100_v18 }
  0xe8   :  { %v101_v20 = vld [vmem:[#allocation2 + $0x8] sm:$0xff] }
  0xe9   :  { %v131_v21 = vpack.c.bf16 %v108_v19, %v108_v19  ;;  %v109_v22 = vadd.f32 %v107_v17, %v101_v20 }
  0xeb   :  { %119 = vst.msk [vmem:[%s196_s3] sm:$0xf] %vm118_vm3, %v131_v21  ;;  %v132_v23 = vpack.c.bf16 %v109_v22, %v109_v22 }
  0xed   :  { %120 = vst.msk [vmem:[%s196_s3 + $0x4] sm:$0xf] %vm118_vm3, %v132_v23 }

// kernel: transformer_qa_forward.18
= control target key start
LH: loop header
LB: loop body
LE: loop exit
PB: predicated region body
PF: predicated region fallthrough
CT: control target
= control target key end

     0   :  { %vm27_vm0 = vcmask 261120   ;;  %v57_v22 = vlaneseq  ;;  %vm79_vm1 = vcmask 257024   ;;  %s149_s0 = inlined_call_operand.vmem [shape: bf16[16,32], index: 0, kind: input, shape index: {}]   ;;  %s150_s1 = inlined_call_operand.vmem [shape: bf16[16,32], index: 1, kind: input, shape index: {}]   ;;  %s151_s2 = inlined_call_operand.vmem [shape: bf16[1,32], index: 2, kind: input, shape index: {}]   ;;  %s152_s3 = inlined_call_operand.vmem [shape: bf16[1,32], index: 3, kind: input, shape index: {}]   ;;  %s153_s4 = inlined_call_operand.vmem [shape: bf16[16,32], index: 4, kind: output, shape index: {}]  }
   0x1   :  { %v91_v0 = vld [vmem:[%s149_s0] sm:$0xff]  }
   0x2   :  { %v95_v1 = vld [vmem:[%s150_s1] sm:$0xff]   ;;  %v92_v2 = vunpack.c.l.bf16 %v91_v0  ;;  %v93_v4 = vunpack.c.h.bf16 %v91_v0  ;;  %v58_v26 = vshrl.u32 %v57_v22, 7 }
   0x3   :  { %v96_v3 = vunpack.c.l.bf16 %v95_v1  ;;  %v97_v5 = vunpack.c.h.bf16 %v95_v1  ;;  %v55_v27 = vld [vmem:[%s151_s2] sm:$0x1] }
   0x4   :  { %v63_v29 = vld [vmem:[%s152_s3] sm:$0x1]  ;;  %v56_v30 = vunpack.c.l.bf16 %v55_v27  ;;  %v59_v31 = vsub.s32 0, %v58_v26 }
   0x5   :  { %v25_v6 = vadd.f32 %v96_v3, %v92_v2  ;;  %v26_v7 = vadd.f32 %v97_v5, %v93_v4  ;;  %v64_v32 = vunpack.c.l.bf16 %v63_v29 }
   0x6   :  { %v60_v33 = vrot.slane %v56_v30, %v59_v31 }
   0x7   :  { %v28_v8 = vsel %vm27_vm0, %v25_v6, 0.0  ;;  %v31_v9 = vsel %vm27_vm0, %v26_v7, 0.0  ;;  %v68_v35 = vrot.slane %v64_v32, %v59_v31 }
   0x8   :  { %29 = vadd.xlane.f32.xlu0 %v28_v8 }
   0xc   :  { %32 = vadd.xlane.f32.xlu0 %v31_v9 }
  0x95   :  { %v30_v10 = vpop.xlane.xlu0 %29 }
  0x96   :  { %v35_v11 = vmul.f32 0.03125, %v30_v10 }
  0x98   :  { %v37_v12 = vsub.f32 %v25_v6, %v35_v11 }
  0x99   :  { %v33_v13 = vpop.xlane.xlu0 %32 }
  0x9a   :  { %v36_v14 = vmul.f32 0.03125, %v33_v13  ;;  %v39_v15 = vmul.f32 %v37_v12, %v37_v12 }
  0x9c   :  { %v38_v16 = vsub.f32 %v26_v7, %v36_v14  ;;  %v41_v17 = vsel %vm27_vm0, %v39_v15, 0.0 }
  0x9d   :  { %42 = vadd.xlane.f32.xlu1 %v41_v17 }
  0x9e   :  { %v40_v18 = vmul.f32 %v38_v16, %v38_v16 }
  0xa0   :  { %v44_v19 = vsel %vm27_vm0, %v40_v18, 0.0 }
  0xa1   :  { %45 = vadd.xlane.f32.xlu1 %v44_v19 }
 0x12a   :  { %v43_v20 = vpop.xlane.xlu1 %42 }
 0x12b   :  { %v47_v21 = vmul.f32 0.03125, %v43_v20 }
 0x12d   :  { %v49_v23 = vadd.f32 1e-05, %v47_v21 }
 0x12e   :  { %v46_v24 = vpop.xlane.xlu1 %45 }
 0x12f   :  { %98 = vrsqrt.f32 %v49_v23  ;;  %v48_v25 = vmul.f32 0.03125, %v46_v24 }
 0x131   :  { %v50_v28 = vadd.f32 1e-05, %v48_v25 }
 0x133   :  { %100 = vrsqrt.f32 %v50_v28 }
 0x139   :  { %v99_v34 = vpop.eup %98 }
 0x13a   :  { %v53_v36 = vmul.f32 %v99_v34, %v37_v12 }
 0x13c   :  { %v61_v37 = vmul.f32 %v60_v33, %v53_v36 }
 0x13d   :  { %v101_v38 = vpop.eup %100 }
 0x13e   :  { %v69_v39 = vadd.f32 %v68_v35, %v61_v37  ;;  %v54_v40 = vmul.f32 %v101_v38, %v38_v16 }
 0x140   :  { %v88_v41 = vpack.c.bf16 %v69_v39, %v69_v39  ;;  %v62_v42 = vmul.f32 %v60_v33, %v54_v40 }
 0x142   :  { %80 = vst.msk [vmem:[%s153_s4] sm:$0xf] %vm79_vm1, %v88_v41  ;;  %v70_v43 = vadd.f32 %v68_v35, %v62_v42 }
 0x144   :  { %v89_v44 = vpack.c.bf16 %v70_v43, %v70_v43 }
 0x146   :  { %81 = vst.msk [vmem:[%s153_s4 + $0x4] sm:$0xf] %vm79_vm1, %v89_v44 }

// kernel: transformer_qa_forward.17
= control target key start
LH: loop header
LB: loop body
LE: loop exit
PB: predicated region body
PF: predicated region fallthrough
CT: control target
= control target key end

     0   :  { %vm19_vm0 = vcmask 261120   ;;  %v148_v0 = vmov 0.0   ;;  %vm149_vm1 = vmmov 0   ;;  %v103_v4 = vlaneseq  ;;  %s193_s1 = inlined_call_operand.vmem [shape: bf16[32,32], index: 1, kind: input, shape index: {}]   ;;  %s194_s0 = inlined_call_operand.vmem [shape: bf16[16,32], index: 0, kind: input, shape index: {}]   ;;  %s195_s2 = inlined_call_operand.vmem [shape: bf16[1,32], index: 2, kind: input, shape index: {}]   ;;  %s196_s3 = inlined_call_operand.vmem [shape: bf16[16,32], index: 3, kind: output, shape index: {}]  }
   0x1   :  { %135 = vmatprep.subr.bf16.mxu0 %v148_v0  ;;  %v145_v1 = vld [vmem:[%s193_s1] sm:$0xff]   ;;  %139 = vmatprep.mubr.msk.bf16.mxu0 %vm149_vm1, %v148_v0  ;;  %20 = vst.msk [vmem:[#allocation2] sm:$0xff] %vm19_vm0, %v148_v0  ;;  %21 = vst.msk [vmem:[#allocation2 + $0x8] sm:$0xff] %vm19_vm0, %v148_v0  ;;  %v146_v2 = vld [vmem:[%s193_s1 + $0x8] sm:$0xff]   ;;  %vm117_vm2 = vcmask 257024  }
   0x2   :  { %136 = vmatpush3.bf16.msra.mxu0 %v145_v1  ;;  %v147_v3 = vld [vmem:[%s194_s0] sm:$0xff]   ;;  %v104_v6 = vshrl.u32 %v103_v4, 7 }
   0x3   :  { %137 = vmatprep.subr.bf16.mxu0 %v148_v0  ;;  %v101_v8 = vld [vmem:[%s195_s2] sm:$0x1] }
   0x4   :  { %v102_v13 = vunpack.c.l.bf16 %v101_v8  ;;  %v105_v14 = vsub.s32 0, %v104_v6 }
   0x6   :  { %138 = vmatpush3.bf16.msra.mxu0 %v146_v2  ;;  %v106_v17 = vrot.slane %v102_v13, %v105_v14 }
   0x8   :  { %v22_v5 = vld [vmem:[#allocation2] sm:$0xff]  ;;  %v23_v9 = vld [vmem:[#allocation2 + $0x8] sm:$0xff] }
   0x9   :  { %140 = vmatmul.mubr.msk.bf16.vlgmr.msra.gmra.mrb[0].mxu0 %vm19_vm0, %v147_v3 }
  0xdc   :  { %v85_v7 = vpop.f32.mrb[0].mxu0 }
  0xdd   :  { %v92_v10 = vadd.f32 %v85_v7, %v22_v5  ;;  %v141_v11 = vpop.f32.mrb[1].mxu0 }
  0xde   :  { %v88_v12 = vpop.f32.mrb[2].mxu0 }
  0xdf   :  { %94 = vst.msk [vmem:[#allocation2] sm:$0xff] %vm19_vm0, %v92_v10  ;;  %v93_v15 = vadd.f32 %v88_v12, %v23_v9  ;;  %v142_v16 = vpop.f32.mrb[3].mxu0 }
  0xe1   :  { %95 = vst.msk [vmem:[#allocation2 + $0x8] sm:$0xff] %vm19_vm0, %v93_v15 }
  0xe6   :  { %v99_v18 = vld [vmem:[#allocation2] sm:$0xff] }
  0xe7   :  { %v107_v19 = vadd.f32 %v106_v17, %v99_v18 }
  0xe8   :  { %v100_v20 = vld [vmem:[#allocation2 + $0x8] sm:$0xff] }
  0xe9   :  { %v130_v21 = vpack.c.bf16 %v107_v19, %v107_v19  ;;  %v108_v22 = vadd.f32 %v106_v17, %v100_v20 }
  0xeb   :  { %118 = vst.msk [vmem:[%s196_s3] sm:$0xf] %vm117_vm2, %v130_v21  ;;  %v131_v23 = vpack.c.bf16 %v108_v22, %v108_v22 }
  0xed   :  { %119 = vst.msk [vmem:[%s196_s3 + $0x4] sm:$0xf] %vm117_vm2, %v131_v23 }

// kernel: transformer_qa_forward.16
= control target key start
LH: loop header
LB: loop body
LE: loop exit
PB: predicated region body
PF: predicated region fallthrough
CT: control target
= control target key end

     0   :  { %s858_s9 = smov 0   ;;  %s957_s0 = inlined_call_operand.vmem [shape: bf16[2,8,96], index: 0, kind: input, shape index: {}]   ;;  %s958_s1 = inlined_call_operand.vmem [shape: f32[2,1,8], index: 1, kind: input, shape index: {}]   ;;  %s959_s2 = inlined_call_operand.vmem [shape: bf16[2,8,32], index: 2, kind: output, shape index: {}]  }
   0x1 LB: > { %s695_s10 = sadd.s32 4294967295, %s825_s9   ;;  %p699_p0 = scmp.ge.s32.totalorder %s825_s9, 1  ;;  %s825_s9 = sphi %s858_s9, %s12_s9  }
   0x2   : > { %p119_p1 = scmp.lt.s32.totalorder %s825_s9, 3 }
   0x4   : > { %p120_p2 = pnand %p699_p0, %p119_p1 }
   0x5   : > { %p142_p3 = scmp.lt.s32.totalorder (!%p120_p2), %s695_s10, 1  ;;  %v827_v0 = vmov (!%p120_p2), 0.0   ;;  %vm828_vm0 = vmmov (!%p120_p2), 0   ;;  %s829_s15 = smov (!%p120_p2), 96   ;;  %vm161_vm1 = vcmask (!%p120_p2), 64512   ;;  %vm233_vm2 = vcmask (!%p120_p2), 1043456  }
   0x6   : > { %123 = sbr.rel (%p120_p2) target bundleno = 1606 (0x646), region = 28  ;;  %730 = vmatprep.subr.bf16.mxu0 (!%p120_p2), %v827_v0  ;;  %732 = vmatprep.mubr.msk.bf16.mxu0 (!%p120_p2), %vm828_vm0, %v827_v0  ;;  %s830_s16 = smov (!%p120_p2), 64   ;;  %vm626_vm3 = vcmask (!%p120_p2), 130048   ;;  %vm628_vm4 = vcmask (!%p120_p2), 195584   ;;  %vm631_vm5 = vcmask (!%p120_p2), 257024  }
   0x7   : > { %736 = vmatprep.subr.bf16.mxu1 (!%p120_p2), %v827_v0  ;;  %738 = vmatprep.mubr.msk.bf16.mxu1 (!%p120_p2), %vm828_vm0, %v827_v0  ;;  %s831_s17 = smov (!%p120_p2), 88   ;;  %s832_s21 = smov (!%p120_p2), 72  }
   0x8   : > { %s833_s22 = smov (!%p120_p2), 120   ;;  %s834_s23 = smov (!%p120_p2), 80  }
   0x9   : > { %s835_s24 = smov (!%p120_p2), 112   ;;  %s836_s25 = smov (!%p120_p2), 104  }
   0xa   : > { %s837_s26 = smov (!%p120_p2), 56   ;;  %s838_s27 = smov (!%p120_p2), 48  }
   0xb   : > { %s839_s28 = smov (!%p120_p2), 40   ;;  %s840_s29 = smov (!%p120_p2), 8  }
   0xc   : > { %s841_s30 = smov (!%p120_p2), 16   ;;  %s842_s3 = smov (!%p120_p2), 24  }
   0xd   : > { %s961_s10 = smov (!%p142_p3, %s695_s10), 1 }
   0xe   : > { %s700_s11 = sshll.u32 %s961_s10, 2  ;;  %s148_s20 = scalar_lea.vmem %s958_s1, %s961_s10 }
   0xf   : > { %s145_s14 = scalar_lea.vmem %s957_s0, %s700_s11  ;;  %v894_v6 = vld [vmem:[%s148_s20] ss:$0 sm:$0xff]  ;;  %s152_s6 = scalar_lea.vmem %s959_s2, %s700_s11 }
  0x10   : > { %v154_v1 = vld [vmem:[%s145_s14] sm:$0xf] }
  0x11   : > { %v880_v2 = vcombine.low %v154_v1, %v154_v1 }
  0x13   : > { %159 = vrot.lane.b32.xlu0 %v880_v2, %s829_s15  ;;  %228 = vrot.lane.b32.xlu1 %v880_v2, %s830_s16 }
  0x17   : > { %279 = vrot.lane.b32.xlu1 %v880_v2, %s831_s17 }
  0x85   : > { %v160_v3 = vpop.permute.xlu0 %159  ;;  %v229_v13 = vpop.permute.xlu1 %228 }
  0x86   : > { %v166_v4 = vsel %vm161_vm1, %v160_v3, 0  ;;  %v235_v14 = vsel %vm233_vm2, %v229_v13, 0 }
  0x87   : > { %731 = vmatpush3.bf16.xpose.msra.mxu0 %v166_v4  ;;  %737 = vmatpush3.bf16.msra.mxu1 %v235_v14 }
  0x88   : > { %748 = vmatprep.subr.bf16.mxu0 %v827_v0  ;;  %742 = vmatprep.subr.bf16.mxu1 %v827_v0 }
  0x89   : > { %v280_v20 = vpop.permute.xlu1 %279 }
  0x8a   : > { %v285_v26 = vsel %vm161_vm1, %v280_v20, 0 }
  0x8e   : > { %733 = vmatmul.mubr.msk.bf16.vlgmr.msra.gmra.mrb[0].mxu0 %vm161_vm1, %v154_v1 }
  0x8f   : > { %750 = vmatprep.mubr.msk.bf16.mxu0 %vm828_vm0, %v827_v0 }
 0x161   : > { %v202_v5 = vpop.f32.mrb[0].mxu0 }
 0x162   : > { %v208_v7 = vmul.f32 0.35355338, %v202_v5  ;;  %v734_v8 = vpop.f32.mrb[1].mxu0 }
 0x163   : > { %v205_v9 = vpop.f32.mrb[2].mxu0 }
 0x164   : > { %v735_v10 = vpop.f32.mrb[3].mxu0  ;;  %v215_v11 = vadd.f32 %v894_v6, %v208_v7 }
 0x166   : > { %v216_v12 = vsel %vm161_vm1, %v215_v11, -inf }
 0x167   : > { %217 = vmax.xlane.f32.xlu0 %v216_v12 }
 0x17d   : > { %503 = vrot.lane.b32.xlu0 %v880_v2, %s832_s21 }
 0x1f4   : > { %v218_v15 = vpop.xlane.xlu0 %217 }
 0x1f5   : > { %v219_v16 = vsub.f32 %v215_v11, %v218_v15 }
 0x1f7   : > { %v220_v17 = vmul.f32 1.442695, %v219_v16 }
 0x1f8   : > { %v504_v29 = vpop.permute.xlu0 %503 }
 0x1f9   : > { %803 = vpow2.f32 %v220_v17  ;;  %v509_v31 = vsel %vm161_vm1, %v504_v29, 0 }
 0x203   : > { %v804_v18 = vpop.eup %803 }
 0x204   : > { %v222_v19 = vsel %vm161_vm1, %v804_v18, 0.0 }
 0x205   : > { %223 = vadd.xlane.f32.xlu1 %v222_v19 }
 0x216   : > { %277 = vrot.lane.b32.xlu1 %v880_v2, %s833_s22 }
 0x21a   : > { %391 = vrot.lane.b32.xlu1 %v880_v2, %s834_s23 }
 0x21e   : > { %389 = vrot.lane.b32.xlu1 %v880_v2, %s835_s24 }
 0x222   : > { %501 = vrot.lane.b32.xlu1 %v880_v2, %s836_s25 }
 0x292   : > { %v224_v21 = vpop.xlane.xlu1 %223 }
 0x293   : > { %805 = vrcp.f32 %v224_v21 }
 0x296   : > { %v278_v24 = vpop.permute.xlu1 %277 }
 0x29a   : > { %v392_v27 = vpop.permute.xlu1 %391 }
 0x29b   : > { %v397_v28 = vsel %vm161_vm1, %v392_v27, 0 }
 0x29d   : > { %v806_v22 = vpop.eup %805 }
 0x29e   : > { %v226_v23 = vmul.f32 %v806_v22, %v804_v18  ;;  %v390_v30 = vpop.permute.xlu1 %389 }
 0x2a0   : > { %v227_v25 = vpack.c.bf16 %v226_v23, %v226_v23 }
 0x2a2   : > { %739 = vmatmul.mubr.msk.bf16.vlgmr.msra.gmra.mrb[0].mxu1 %vm161_vm1, %v227_v25  ;;  %v502_v32 = vpop.permute.xlu1 %501 }
 0x2a3   : > { %743 = vmatpush3.bf16.xpose.msra.mxu1 %v285_v26  ;;  %744 = vmatprep.mubr.msk.bf16.mxu1 %vm828_vm0, %v827_v0 }
 0x2a4   : > { %754 = vmatprep.subr.bf16.mxu1 %v827_v0 }
 0x2aa   : > { %745 = vmatmul.mubr.msk.bf16.vlgmr.msra.gmra.mrb[4].mxu1 %vm161_vm1, %v278_v24 }
 0x2ab   : > { %755 = vmatpush3.bf16.xpose.msra.mxu1 %v397_v28  ;;  %756 = vmatprep.mubr.msk.bf16.mxu1 %vm828_vm0, %v827_v0 }
 0x2ac   : > { %766 = vmatprep.subr.bf16.mxu1 %v827_v0 }
 0x2b2   : > { %757 = vmatmul.mubr.msk.bf16.vlgmr.msra.gmra.mrb[8].mxu1 %vm161_vm1, %v390_v30 }
 0x2b3   : > { %767 = vmatpush3.bf16.xpose.msra.mxu1 %v509_v31  ;;  %768 = vmatprep.mubr.msk.bf16.mxu1 %vm828_vm0, %v827_v0 }
 0x2ba   : > { %769 = vmatmul.mubr.msk.bf16.vlgmr.msra.gmra.mrb[12].mxu1 %vm161_vm1, %v502_v32 }
 0x375   : > { %v921_v33 = vpop.f32.mrb[0].mxu1 }
 0x376   : > { %v740_v34 = vpop.f32.mrb[1].mxu1 }
 0x377   : > { %v274_v35 = vpop.f32.mrb[2].mxu1 }
 0x378   : > { %v741_v36 = vpop.f32.mrb[3].mxu1 }
 0x37d   : > { %v321_v37 = vpop.f32.mrb[4].mxu1 }
 0x37e   : > { %v327_v38 = vmul.f32 0.35355338, %v321_v37  ;;  %v746_v39 = vpop.f32.mrb[5].mxu1 }
 0x37f   : > { %v324_v40 = vpop.f32.mrb[6].mxu1 }
 0x380   : > { %v747_v41 = vpop.f32.mrb[7].mxu1  ;;  %v328_v42 = vadd.f32 %v894_v6, %v327_v38 }
 0x382   : > { %v329_v43 = vsel %vm161_vm1, %v328_v42, -inf }
 0x383   : > { %330 = vmax.xlane.f32.xlu1 %v329_v43 }
 0x385   : > { %v433_v44 = vpop.f32.mrb[8].mxu1 }
 0x386   : > { %v439_v45 = vmul.f32 0.35355338, %v433_v44  ;;  %v758_v46 = vpop.f32.mrb[9].mxu1 }
 0x387   : > { %v436_v47 = vpop.f32.mrb[10].mxu1 }
 0x388   : > { %v440_v48 = vadd.f32 %v894_v6, %v439_v45  ;;  %v759_v49 = vpop.f32.mrb[11].mxu1 }
 0x38a   : > { %v441_v50 = vsel %vm161_vm1, %v440_v48, -inf }
 0x38b   : > { %442 = vmax.xlane.f32.xlu0 %v441_v50 }
 0x38d   : > { %v545_v51 = vpop.f32.mrb[12].mxu1 }
 0x38e   : > { %v551_v52 = vmul.f32 0.35355338, %v545_v51  ;;  %v770_v53 = vpop.f32.mrb[13].mxu1 }
 0x38f   : > { %v548_v54 = vpop.f32.mrb[14].mxu1 }
 0x390   : > { %v552_v55 = vadd.f32 %v894_v6, %v551_v52  ;;  %v771_v56 = vpop.f32.mrb[15].mxu1 }
 0x392   : > { %v553_v57 = vsel %vm161_vm1, %v552_v55, -inf }
 0x393   : > { %554 = vmax.xlane.f32.xlu1 %v553_v57 }
 0x410   : > { %v331_v58 = vpop.xlane.xlu1 %330 }
 0x411   : > { %v332_v59 = vsub.f32 %v328_v42, %v331_v58 }
 0x413   : > { %v333_v60 = vmul.f32 1.442695, %v332_v59 }
 0x415   : > { %807 = vpow2.f32 %v333_v60 }
 0x418   : > { %v443_v6 = vpop.xlane.xlu0 %442 }
 0x419   : > { %v444_v7 = vsub.f32 %v440_v48, %v443_v6 }
 0x41b   : > { %v445_v8 = vmul.f32 1.442695, %v444_v7 }
 0x41f   : > { %v808_v61 = vpop.eup %807 }
 0x420   : > { %v555_v62 = vpop.xlane.xlu1 %554  ;;  %v335_v63 = vsel %vm161_vm1, %v808_v61, 0.0 }
 0x421   : > { %v556_v1 = vsub.f32 %v552_v55, %v555_v62  ;;  %336 = vadd.xlane.f32.xlu1 %v335_v63 }
 0x423   : > { %v557_v3 = vmul.f32 1.442695, %v556_v1 }
 0x425   : > { %809 = vpow2.f32 %v557_v3 }
 0x426   : > { %811 = vpow2.f32 %v445_v8 }
 0x42f   : > { %v810_v4 = vpop.eup %809 }
 0x430   : > { %v559_v5 = vsel %vm161_vm1, %v810_v4, 0.0  ;;  %v812_v9 = vpop.eup %811 }
 0x431   : > { %560 = vadd.xlane.f32.xlu0 %v559_v5  ;;  %v447_v10 = vsel %vm161_vm1, %v812_v9, 0.0 }
 0x432   : > { %341 = vrot.lane.b32.xlu1 %v880_v2, %s837_s26 }
 0x447   : > { %453 = vrot.lane.b32.xlu0 %v880_v2, %s838_s27 }
 0x456   : > { %448 = vadd.xlane.f32.xlu1 %v447_v10 }
 0x467   : > { %565 = vrot.lane.b32.xlu1 %v880_v2, %s839_s28 }
 0x4ae   : > { %v337_v11 = vpop.xlane.xlu1 %336 }
 0x4af   : > { %813 = vrcp.f32 %v337_v11 }
 0x4b2   : > { %v342_v12 = vpop.permute.xlu1 %341 }
 0x4b3   : > { %v347_v13 = vsel %vm233_vm2, %v342_v12, 0 }
 0x4b4   : > { %749 = vmatpush3.bf16.msra.mxu0 %v347_v13 }
 0x4b5   : > { %760 = vmatprep.subr.bf16.mxu0 %v827_v0 }
 0x4b9   : > { %v814_v14 = vpop.eup %813 }
 0x4ba   : > { %v339_v15 = vmul.f32 %v814_v14, %v808_v61 }
 0x4bc   : > { %v340_v16 = vpack.c.bf16 %v339_v15, %v339_v15 }
 0x4be   : > { %751 = vmatmul.mubr.msk.bf16.vlgmr.msra.gmra.mrb[4].mxu0 %vm161_vm1, %v340_v16  ;;  %v561_v17 = vpop.xlane.xlu0 %560 }
 0x4bf   : > { %762 = vmatprep.mubr.msk.bf16.mxu0 %vm828_vm0, %v827_v0 }
 0x4c2   : > { %v454_v18 = vpop.permute.xlu0 %453 }
 0x4c3   : > { %v459_v2 = vsel %vm233_vm2, %v454_v18, 0 }
 0x4c4   : > { %761 = vmatpush3.bf16.msra.mxu0 %v459_v2 }
 0x4c5   : > { %772 = vmatprep.subr.bf16.mxu0 %v827_v0 }
 0x4e3   : > { %v449_v19 = vpop.xlane.xlu1 %448 }
 0x4e4   : > { %815 = vrcp.f32 %v449_v19 }
 0x4e5   : > { %817 = vrcp.f32 %v561_v17 }
 0x4e7   : > { %v566_v21 = vpop.permute.xlu1 %565 }
 0x4e8   : > { %v571_v23 = vsel %vm233_vm2, %v566_v21, 0 }
 0x4ee   : > { %v816_v20 = vpop.eup %815 }
 0x4ef   : > { %v451_v22 = vmul.f32 %v816_v20, %v812_v9  ;;  %v818_v25 = vpop.eup %817 }
 0x4f0   : > { %v563_v26 = vmul.f32 %v818_v25, %v810_v4 }
 0x4f1   : > { %v452_v24 = vpack.c.bf16 %v451_v22, %v451_v22 }
 0x4f2   : > { %v564_v27 = vpack.c.bf16 %v563_v26, %v563_v26 }
 0x4f3   : > { %763 = vmatmul.mubr.msk.bf16.vlgmr.msra.gmra.mrb[8].mxu0 %vm161_vm1, %v452_v24 }
 0x4f4   : > { %773 = vmatpush3.bf16.msra.mxu0 %v571_v23  ;;  %774 = vmatprep.mubr.msk.bf16.mxu0 %vm828_vm0, %v827_v0 }
 0x4fb   : > { %775 = vmatmul.mubr.msk.bf16.vlgmr.msra.gmra.mrb[12].mxu0 %vm161_vm1, %v564_v27 }
 0x591   : > { %v383_v28 = vpop.f32.mrb[4].mxu0 }
 0x592   : > { %614 = vrot.lane.b32.xlu1 %v383_v28, %s840_s29  ;;  %v752_v29 = vpop.f32.mrb[5].mxu0 }
 0x593   : > { %v386_v30 = vpop.f32.mrb[6].mxu0 }
 0x594   : > { %v753_v31 = vpop.f32.mrb[7].mxu0 }
 0x5c6   : > { %v495_v32 = vpop.f32.mrb[8].mxu0 }
 0x5c7   : > { %618 = vrot.lane.b32.xlu0 %v495_v32, %s841_s30  ;;  %v764_v34 = vpop.f32.mrb[9].mxu0 }
 0x5c8   : > { %v498_v35 = vpop.f32.mrb[10].mxu0 }
 0x5c9   : > { %v765_v36 = vpop.f32.mrb[11].mxu0 }
 0x5ce   : > { %v607_v37 = vpop.f32.mrb[12].mxu0 }
 0x5cf   : > { %622 = vrot.lane.b32.xlu1 %v607_v37, %s842_s3  ;;  %v776_v0 = vpop.f32.mrb[13].mxu0 }
 0x5d0   : > { %v610_v38 = vpop.f32.mrb[14].mxu0 }
 0x5d1   : > { %v777_v39 = vpop.f32.mrb[15].mxu0 }
 0x604   : > { %v615_v40 = vpop.permute.xlu1 %614 }
 0x605   : > { %v625_v42 = vsel %vm161_vm1, %v921_v33, %v615_v40 }
 0x639   : > { %v619_v41 = vpop.permute.xlu0 %618 }
 0x63a   : > { %v627_v43 = vsel %vm626_vm3, %v625_v42, %v619_v41 }
 0x641   : > { %v623_v44 = vpop.permute.xlu1 %622 }
 0x642   : > { %v629_v45 = vsel %vm628_vm4, %v627_v43, %v623_v44 }
 0x643   : > { %v630_v46 = vpack.c.bf16 %v629_v45, %v629_v45 }
 0x645   : > { %632 = vst.msk [vmem:[%s152_s6] sm:$0xf] %vm631_vm5, %v630_v46 }
 0x646 PF: > { %s12_s9 = sadd.s32 1, %s825_s9  }
 0x647   : > { %p9_p4 = scmp.ge.s32.totalorder %s12_s9, 4  }
 0x649   :  { %11 = sbr.rel (!%p9_p4) target bundleno = 1 (0x1), region = 61 }

// kernel: transformer_qa_forward.20
= control target key start
LH: loop header
LB: loop body
LE: loop exit
PB: predicated region body
PF: predicated region fallthrough
CT: control target
= control target key end

     0   :  { %vm19_vm0 = vcmask 261120   ;;  %v175_v0 = vmov 0.0   ;;  %vm176_vm1 = vmmov 0   ;;  %vm63_vm2 = vcmask 523264   ;;  %s225_s1 = inlined_call_operand.vmem [shape: bf16[64,32], index: 1, kind: input, shape index: {}]   ;;  %s226_s0 = inlined_call_operand.vmem [shape: bf16[16,64], index: 0, kind: input, shape index: {}]   ;;  %s227_s2 = inlined_call_operand.vmem [shape: bf16[1,32], index: 2, kind: input, shape index: {}]   ;;  %s228_s3 = inlined_call_operand.vmem [shape: bf16[16,32], index: 3, kind: output, shape index: {}]  }
   0x1   :  { %156 = vmatprep.subr.bf16.mxu0 %v175_v0  ;;  %v170_v1 = vld [vmem:[%s225_s1] sm:$0xff]   ;;  %164 = vmatprep.mubr.msk.bf16.mxu0 %vm176_vm1, %v175_v0  ;;  %20 = vst.msk [vmem:[#allocation2] sm:$0xff] %vm19_vm0, %v175_v0  ;;  %21 = vst.msk [vmem:[#allocation2 + $0x8] sm:$0xff] %vm19_vm0, %v175_v0  ;;  %v171_v2 = vld [vmem:[%s225_s1 + $0x8] sm:$0xff]   ;;  %v120_v6 = vlaneseq  ;;  %vm134_vm3 = vcmask 257024  }
   0x2   :  { %157 = vmatpush3.bf16.msra.mxu0 %v170_v1  ;;  %v172_v3 = vld [vmem:[%s225_s1 + $0x10] sm:$0xff]   ;;  %v173_v4 = vld [vmem:[%s225_s1 + $0x18] sm:$0xff]   ;;  %v174_v5 = vld [vmem:[%s226_s0] sm:$0xff]  }
   0x3   :  { %158 = vmatprep.subr.bf16.mxu0 %v175_v0  ;;  %v121_v8 = vshrl.u32 %v120_v6, 7  ;;  %v118_v10 = vld [vmem:[%s227_s2] sm:$0x1] }
   0x4   :  { %v119_v15 = vunpack.c.l.bf16 %v118_v10 }
   0x5   :  { %v122_v16 = vsub.s32 0, %v121_v8 }
   0x6   :  { %159 = vmatpush3.bf16.msra.mxu0 %v171_v2 }
   0x7   :  { %160 = vmatprep.subr.bf16.mxu0 %v175_v0  ;;  %v123_v19 = vrot.slane %v119_v15, %v122_v16 }
   0x8   :  { %v22_v7 = vld [vmem:[#allocation2] sm:$0xff]  ;;  %v23_v11 = vld [vmem:[#allocation2 + $0x8] sm:$0xff] }
   0xa   :  { %161 = vmatpush3.bf16.msra.mxu0 %v172_v3 }
   0xb   :  { %162 = vmatprep.subr.bf16.mxu0 %v175_v0 }
   0xe   :  { %163 = vmatpush3.bf16.msra.mxu0 %v173_v4 }
  0x11   :  { %165 = vmatmul.mubr.msk.bf16.vlgmr.msra.gmra.mrb[0].mxu0 %vm63_vm2, %v174_v5 }
  0xe4   :  { %v101_v9 = vpop.f32.mrb[0].mxu0 }
  0xe5   :  { %v108_v12 = vadd.f32 %v101_v9, %v22_v7  ;;  %v166_v13 = vpop.f32.mrb[1].mxu0 }
  0xe6   :  { %v104_v14 = vpop.f32.mrb[2].mxu0 }
  0xe7   :  { %111 = vst.msk [vmem:[#allocation2] sm:$0xff] %vm19_vm0, %v108_v12  ;;  %v109_v17 = vadd.f32 %v104_v14, %v23_v11  ;;  %v167_v18 = vpop.f32.mrb[3].mxu0 }
  0xe9   :  { %112 = vst.msk [vmem:[#allocation2 + $0x8] sm:$0xff] %vm19_vm0, %v109_v17 }
  0xee   :  { %v116_v20 = vld [vmem:[#allocation2] sm:$0xff] }
  0xef   :  { %v124_v21 = vadd.f32 %v123_v19, %v116_v20 }
  0xf0   :  { %v117_v22 = vld [vmem:[#allocation2 + $0x8] sm:$0xff] }
  0xf1   :  { %v149_v23 = vpack.c.bf16 %v124_v21, %v124_v21  ;;  %v125_v24 = vadd.f32 %v123_v19, %v117_v22 }
  0xf3   :  { %135 = vst.msk [vmem:[%s228_s3] sm:$0xf] %vm134_vm3, %v149_v23  ;;  %v150_v25 = vpack.c.bf16 %v125_v24, %v125_v24 }
  0xf5   :  { %136 = vst.msk [vmem:[%s228_s3 + $0x4] sm:$0xf] %vm134_vm3, %v150_v25 }

// kernel: transformer_qa_forward.19
= control target key start
LH: loop header
LB: loop body
LE: loop exit
PB: predicated region body
PF: predicated region fallthrough
CT: control target
= control target key end

     0   :  { %vm19_vm0 = vcmask 523264   ;;  %v151_v0 = vmov 0.0   ;;  %vm152_vm1 = vmmov 0   ;;  %vm47_vm2 = vcmask 261120   ;;  %s195_s1 = inlined_call_operand.vmem [shape: bf16[32,64], index: 1, kind: input, shape index: {}]   ;;  %s196_s0 = inlined_call_operand.vmem [shape: bf16[16,32], index: 0, kind: input, shape index: {}]   ;;  %s197_s2 = inlined_call_operand.vmem [shape: bf16[1,64], index: 2, kind: input, shape index: {}]   ;;  %s198_s3 = inlined_call_operand.vmem [shape: bf16[16,64], index: 3, kind: output, shape index: {}]  }
   0x1   :  { %138 = vmatprep.subr.bf16.mxu0 %v151_v0  ;;  %v148_v1 = vld [vmem:[%s195_s1] sm:$0xff]   ;;  %142 = vmatprep.mubr.msk.bf16.mxu0 %vm152_vm1, %v151_v0  ;;  %20 = vst.msk [vmem:[#allocation2] sm:$0xff] %vm19_vm0, %v151_v0  ;;  %21 = vst.msk [vmem:[#allocation2 + $0x8] sm:$0xff] %vm19_vm0, %v151_v0  ;;  %v149_v2 = vld [vmem:[%s195_s1 + $0x8] sm:$0xff]   ;;  %v104_v4 = vlaneseq  ;;  %vm120_vm3 = vcmask 519168  }
   0x2   :  { %139 = vmatpush3.bf16.msra.mxu0 %v148_v1  ;;  %v150_v3 = vld [vmem:[%s196_s0] sm:$0xff]  }
   0x3   :  { %140 = vmatprep.subr.bf16.mxu0 %v151_v0  ;;  %v105_v6 = vshrl.u32 %v104_v4, 7  ;;  %v102_v8 = vld [vmem:[%s197_s2] sm:$0x1] }
   0x4   :  { %v103_v13 = vunpack.c.l.bf16 %v102_v8 }
   0x5   :  { %v106_v14 = vsub.s32 0, %v105_v6 }
   0x6   :  { %141 = vmatpush3.bf16.msra.mxu0 %v149_v2 }
   0x7   :  { %v107_v17 = vrot.slane %v103_v13, %v106_v14 }
   0x8   :  { %v22_v5 = vld [vmem:[#allocation2] sm:$0xff]  ;;  %v23_v9 = vld [vmem:[#allocation2 + $0x8] sm:$0xff] }
   0x9   :  { %143 = vmatmul.mubr.msk.bf16.vlgmr.msra.gmra.mrb[0].mxu0 %vm47_vm2, %v150_v3 }
  0xdc   :  { %v85_v7 = vpop.f32.mrb[0].mxu0 }
  0xdd   :  { %v92_v10 = vadd.f32 %v85_v7, %v22_v5  ;;  %v144_v11 = vpop.f32.mrb[1].mxu0 }
  0xde   :  { %v88_v12 = vpop.f32.mrb[2].mxu0 }
  0xdf   :  { %95 = vst.msk [vmem:[#allocation2] sm:$0xff] %vm19_vm0, %v92_v10  ;;  %v93_v15 = vadd.f32 %v88_v12, %v23_v9  ;;  %v145_v16 = vpop.f32.mrb[3].mxu0 }
  0xe1   :  { %96 = vst.msk [vmem:[#allocation2 + $0x8] sm:$0xff] %vm19_vm0, %v93_v15 }
  0xe6   :  { %v100_v18 = vld [vmem:[#allocation2] sm:$0xff] }
  0xe7   :  { %v108_v19 = vadd.f32 %v107_v17, %v100_v18 }
  0xe8   :  { %v101_v20 = vld [vmem:[#allocation2 + $0x8] sm:$0xff] }
  0xe9   :  { %v110_v21 = vmax.f32 %v108_v19, 0.0  ;;  %v109_v22 = vadd.f32 %v107_v17, %v101_v20 }
  0xeb   :  { %v133_v23 = vpack.c.bf16 %v110_v21, %v110_v21  ;;  %v111_v24 = vmax.f32 %v109_v22, 0.0 }
  0xed   :  { %121 = vst.msk [vmem:[%s198_s3] sm:$0xf] %vm120_vm3, %v133_v23  ;;  %v134_v25 = vpack.c.bf16 %v111_v24, %v111_v24 }
  0xef   :  { %122 = vst.msk [vmem:[%s198_s3 + $0x4] sm:$0xf] %vm120_vm3, %v134_v25 }

// kernel: transformer_qa_forward.29
= control target key start
LH: loop header
LB: loop body
LE: loop exit
PB: predicated region body
PF: predicated region fallthrough
CT: control target
= control target key end

     0   :  { %v151_v0 = vmov 0.0   ;;  %vm152_vm0 = vmmov 0   ;;  %vm46_vm1 = vcmask 261120   ;;  %v102_v4 = vlaneseq  ;;  %s188_s1 = inlined_call_operand.vmem [shape: bf16[32,128], index: 1, kind: input, shape index: {}]   ;;  %s189_s0 = inlined_call_operand.vmem [shape: bf16[16,32], index: 0, kind: input, shape index: {}]   ;;  %s190_s2 = inlined_call_operand.vmem [shape: bf16[1,128], index: 2, kind: input, shape index: {}]   ;;  %s191_s3 = inlined_call_operand.vmem [shape: bf16[16,128], index: 3, kind: output, shape index: {}]  }
   0x1   :  { %138 = vmatprep.subr.bf16.mxu0 %v151_v0  ;;  %v148_v1 = vld [vmem:[%s188_s1] sm:$0xff]   ;;  %142 = vmatprep.mubr.msk.bf16.mxu0 %vm152_vm0, %v151_v0  ;;  %v149_v2 = vld [vmem:[%s188_s1 + $0x8] sm:$0xff]  }
   0x2   :  { %139 = vmatpush3.bf16.msra.mxu0 %v148_v1  ;;  %v150_v3 = vld [vmem:[%s189_s0] sm:$0xff]   ;;  %v103_v5 = vshrl.u32 %v102_v4, 7 }
   0x3   :  { %140 = vmatprep.subr.bf16.mxu0 %v151_v0  ;;  %v100_v6 = vld [vmem:[%s190_s2] sm:$0x1] }
   0x4   :  { %v101_v7 = vunpack.c.l.bf16 %v100_v6  ;;  %v104_v8 = vsub.s32 0, %v103_v5 }
   0x6   :  { %141 = vmatpush3.bf16.msra.mxu0 %v149_v2  ;;  %v105_v9 = vrot.slane %v101_v7, %v104_v8 }
   0x9   :  { %143 = vmatmul.mubr.msk.bf16.vlgmr.msra.gmra.mrb[0].mxu0 %vm46_vm1, %v150_v3 }
  0xdc   :  { %v84_v10 = vpop.f32.mrb[0].mxu0 }
  0xdd   :  { %v144_v11 = vpop.f32.mrb[1].mxu0  ;;  %v106_v13 = vadd.f32 %v105_v9, %v84_v10 }
  0xde   :  { %v87_v12 = vpop.f32.mrb[2].mxu0 }
  0xdf   :  { %v107_v14 = vadd.f32 %v105_v9, %v87_v12  ;;  %v145_v15 = vpop.f32.mrb[3].mxu0 }
  0xe1   :  { %v133_v16 = vpack.c.bf16 %v107_v14, %v106_v13 }
  0xe3   :  { %134 = vst [vmem:[%s191_s3] sm:$0xff] %v133_v16  }

</bundles_post_ra>
